<compile_context>
chip_gen: v7x
topology: tpu7x:2x2x1
jax: 0.10.0
libtpu: 0.0.40
codegen_flags: <defaults>
</compile_context>

<pallas_src>
import functools

import jax
import jax.numpy as jnp
from jax.experimental import pallas as pl
from jax.experimental.pallas import tpu as pltpu

EPS = 1e-5
LANE = 128
MM_DTYPE = jnp.bfloat16      # MXU operand dtype (set to jnp.float32 for exact-f32 matmuls)
VMEM_LIMIT = 48 * 1024 * 1024


def _round_up(x, m):
    return (x + m - 1) // m * m


# --------------------------------------------------------------------------------------
# Pass 1: conv1 (k=3, pad=1) and 1x1 upsample conv fused into one lane-dense matmul,
#         plus per-channel sum / sum-of-squares accumulated across the batch grid axis.
# --------------------------------------------------------------------------------------
def _conv1_up_kernel(x_ref, w_ref, z_ref, sum_ref, ssq_ref, slab_ref):
    # x_ref:    (1, L, Cpi)   bf16   channels-last, channel-padded input (no L padding)
    # w_ref:    (3*Cpi, 2*Cp) bf16   [conv1 | 1x1 upsample (center tap rows only)]
    # z_ref:    (1, L, 2*Cp)  f32    raw outputs [h_raw | up_raw]
    # sum_ref:  (1, 2*Cp)     f32    resident accumulator (sum over N*L)
    # ssq_ref:  (1, 2*Cp)     f32    resident accumulator (sum of squares)
    # slab_ref: (L, 3*Cpi)    f32    im2col slab; halo rows stay zero after init
    n = pl.program_id(0)
    L = z_ref.shape[1]
    Cpi = x_ref.shape[2]

    @pl.when(n == 0)
    def _init():
        sum_ref[...] = jnp.zeros_like(sum_ref)
        ssq_ref[...] = jnp.zeros_like(ssq_ref)
        slab_ref[...] = jnp.zeros_like(slab_ref)   # boundary halo rows remain 0 forever

    x = x_ref[0].astype(jnp.float32)               # (L, Cpi)

    # im2col: slab[l] = [x[l-1], x[l], x[l+1]] with implicit zeros at the L boundaries.
    slab_ref[1:L, 0:Cpi] = x[0:L - 1, :]
    slab_ref[:, Cpi:2 * Cpi] = x
    slab_ref[0:L - 1, 2 * Cpi:3 * Cpi] = x[1:L, :]

    z = jnp.dot(slab_ref[...].astype(MM_DTYPE), w_ref[...],
                preferred_element_type=jnp.float32)          # (L, 2*Cp), one MXU call
    z_ref[0] = z
    sum_ref[...] += jnp.sum(z, axis=0, keepdims=True)
    ssq_ref[...] += jnp.sum(z * z, axis=0, keepdims=True)


# --------------------------------------------------------------------------------------
# Pass 2: BN1 (batch stats) + ReLU + conv2 (k=3, pad=1, im2col-folded) + stats for BN2.
# --------------------------------------------------------------------------------------
def _bn1_relu_conv2_kernel(z_ref, s1_ref, q1_ref, bn_ref, w2_ref,
                           y_ref, sum2_ref, ssq2_ref, slab_ref, *, count):
    # z_ref:   (1, L, Cp)  f32  h_raw (first channel-half of pass-1 output via index_map)
    # s1/q1:   (1, Cp)     f32  batch sum / sum-of-squares of h_raw
    # bn_ref:  (6, Cp)     f32  packed [g1, b1, g2, b2, gu, bu]
    # w2_ref:  (3*Cp, Cp)  bf16 conv2 weights (im2col layout)
    # y_ref:   (1, L, Cp)  f32  raw conv2 output
    # sum2/ssq2: (1, Cp)   f32  resident accumulators for BN2 statistics
    # slab_ref:  (L, 3*Cp) f32  im2col slab for conv2
    n = pl.program_id(0)
    L = y_ref.shape[1]
    Cp = y_ref.shape[2]

    @pl.when(n == 0)
    def _init():
        sum2_ref[...] = jnp.zeros_like(sum2_ref)
        ssq2_ref[...] = jnp.zeros_like(ssq2_ref)
        slab_ref[...] = jnp.zeros_like(slab_ref)

    inv = float(1.0 / count)
    mu = s1_ref[...] * inv                                   # (1, Cp)
    var = q1_ref[...] * inv - mu * mu                        # biased variance (train BN)
    scale = bn_ref[0:1, :] * jax.lax.rsqrt(var + EPS)        # per-channel, computed once
    shift = bn_ref[1:2, :] - mu * scale
    h = jnp.maximum(z_ref[0] * scale + shift, 0.0)           # (L, Cp) f32

    slab_ref[1:L, 0:Cp] = h[0:L - 1, :]
    slab_ref[:, Cp:2 * Cp] = h
    slab_ref[0:L - 1, 2 * Cp:3 * Cp] = h[1:L, :]

    y = jnp.dot(slab_ref[...].astype(MM_DTYPE), w2_ref[...],
                preferred_element_type=jnp.float32)          # (L, Cp)
    y_ref[0] = y
    sum2_ref[...] += jnp.sum(y, axis=0, keepdims=True)
    ssq2_ref[...] += jnp.sum(y * y, axis=0, keepdims=True)


# --------------------------------------------------------------------------------------
# Pass 3: BN2 + BN(upsample) + residual add + ReLU (pure elementwise, lane-dense).
# --------------------------------------------------------------------------------------
def _finalize_kernel(y_ref, up_ref, s2_ref, q2_ref, su_ref, qu_ref, bn_ref, out_ref, *, count):
    inv = float(1.0 / count)

    mu2 = s2_ref[...] * inv
    var2 = q2_ref[...] * inv - mu2 * mu2
    sc2 = bn_ref[2:3, :] * jax.lax.rsqrt(var2 + EPS)
    sh2 = bn_ref[3:4, :] - mu2 * sc2

    muu = su_ref[...] * inv
    varu = qu_ref[...] * inv - muu * muu
    scu = bn_ref[4:5, :] * jax.lax.rsqrt(varu + EPS)
    shu = bn_ref[5:6, :] - muu * scu

    out = (y_ref[0] * sc2 + sh2) + (up_ref[0] * scu + shu)
    out_ref[0] = jnp.maximum(out, 0.0)


# --------------------------------------------------------------------------------------
# Wrapper
# --------------------------------------------------------------------------------------
def resblock_forward(x_ncl, params):
    N, Cin, L = x_ncl.shape
    Cout = params['w1'].shape[0]
    Cpi = _round_up(Cin, LANE)
    Cp = _round_up(Cout, LANE)
    M = N * L

    # ---- glue: layout conversion + weight packing (plain JAX) ----
    xc = jnp.transpose(x_ncl, (0, 2, 1)).astype(MM_DTYPE)            # (N, L, Cin)
    xc = jnp.pad(xc, ((0, 0), (0, 0), (0, Cpi - Cin)))               # channel pad only

    w1t = jnp.transpose(params['w1'], (2, 1, 0))                     # (3, Cin, Cout)
    W1 = jnp.zeros((3, Cpi, Cp), jnp.float32).at[:, :Cin, :Cout].set(w1t)
    Wu = jnp.zeros((3, Cpi, Cp), jnp.float32).at[1, :Cin, :Cout].set(params['wu'][:, :, 0].T)
    W1u = jnp.concatenate([W1, Wu], axis=-1).reshape(3 * Cpi, 2 * Cp).astype(MM_DTYPE)

    w2t = jnp.transpose(params['w2'], (2, 1, 0))                     # (3, Cout, Cout)
    W2 = (jnp.zeros((3, Cp, Cp), jnp.float32).at[:, :Cout, :Cout].set(w2t)
          .reshape(3 * Cp, Cp).astype(MM_DTYPE))

    bn = jnp.zeros((6, Cp), jnp.float32)
    for i, k in enumerate(('g1', 'b1', 'g2', 'b2', 'gu', 'bu')):
        bn = bn.at[i, :Cout].set(params[k].astype(jnp.float32))

    cp_red = pltpu.CompilerParams(dimension_semantics=("arbitrary",),
                                  vmem_limit_bytes=VMEM_LIMIT)
    cp_par = pltpu.CompilerParams(dimension_semantics=("parallel",),
                                  vmem_limit_bytes=VMEM_LIMIT)

    # ---- pass 1: conv1 + fused 1x1 upsample, plus BN1/BNu statistics ----
    z_raw, s1u, q1u = pl.pallas_call(
        _conv1_up_kernel,
        out_shape=(jax.ShapeDtypeStruct((N, L, 2 * Cp), jnp.float32),
                   jax.ShapeDtypeStruct((1, 2 * Cp), jnp.float32),
                   jax.ShapeDtypeStruct((1, 2 * Cp), jnp.float32)),
        grid=(N,),
        in_specs=[pl.BlockSpec((1, L, Cpi), lambda n: (n, 0, 0)),
                  pl.BlockSpec((3 * Cpi, 2 * Cp), lambda n: (0, 0))],
        out_specs=(pl.BlockSpec((1, L, 2 * Cp), lambda n: (n, 0, 0)),
                   pl.BlockSpec((1, 2 * Cp), lambda n: (0, 0)),
                   pl.BlockSpec((1, 2 * Cp), lambda n: (0, 0))),
        scratch_shapes=[pltpu.VMEM((L, 3 * Cpi), jnp.float32)],
        compiler_params=cp_red,
    )(xc, W1u)

    # ---- pass 2: BN1 + ReLU + conv2, plus BN2 statistics ----
    y_raw, s2, q2 = pl.pallas_call(
        functools.partial(_bn1_relu_conv2_kernel, count=M),
        out_shape=(jax.ShapeDtypeStruct((N, L, Cp), jnp.float32),
                   jax.ShapeDtypeStruct((1, Cp), jnp.float32),
                   jax.ShapeDtypeStruct((1, Cp), jnp.float32)),
        grid=(N,),
        in_specs=[pl.BlockSpec((1, L, Cp), lambda n: (n, 0, 0)),   # h half of z_raw
                  pl.BlockSpec((1, Cp), lambda n: (0, 0)),         # sum (h half)
                  pl.BlockSpec((1, Cp), lambda n: (0, 0)),         # sumsq (h half)
                  pl.BlockSpec((6, Cp), lambda n: (0, 0)),         # packed gamma/beta
                  pl.BlockSpec((3 * Cp, Cp), lambda n: (0, 0))],
        out_specs=(pl.BlockSpec((1, L, Cp), lambda n: (n, 0, 0)),
                   pl.BlockSpec((1, Cp), lambda n: (0, 0)),
                   pl.BlockSpec((1, Cp), lambda n: (0, 0))),
        scratch_shapes=[pltpu.VMEM((L, 3 * Cp), jnp.float32)],
        compiler_params=cp_red,
    )(z_raw, s1u, q1u, bn, W2)

    # ---- pass 3: BN2 + BNu + residual add + ReLU ----
    out_pad = pl.pallas_call(
        functools.partial(_finalize_kernel, count=M),
        out_shape=jax.ShapeDtypeStruct((N, L, Cp), jnp.float32),
        grid=(N,),
        in_specs=[pl.BlockSpec((1, L, Cp), lambda n: (n, 0, 0)),   # y_raw
                  pl.BlockSpec((1, L, Cp), lambda n: (n, 0, 1)),   # up half of z_raw
                  pl.BlockSpec((1, Cp), lambda n: (0, 0)),         # s2
                  pl.BlockSpec((1, Cp), lambda n: (0, 0)),         # q2
                  pl.BlockSpec((1, Cp), lambda n: (0, 1)),         # su (up half)
                  pl.BlockSpec((1, Cp), lambda n: (0, 1)),         # qu (up half)
                  pl.BlockSpec((6, Cp), lambda n: (0, 0))],
        out_specs=pl.BlockSpec((1, L, Cp), lambda n: (n, 0, 0)),
        compiler_params=cp_par,
    )(y_raw, z_raw, s2, q2, s1u, q1u, bn)

    return jnp.transpose(out_pad[:, :, :Cout], (0, 2, 1))          # back to (N, Cout, L)


# --------------------------------------------------------------------------------------
# Pure-JAX reference mirroring the PyTorch forward (training-mode BN) with the same
# mixed-precision policy (bf16 matmul operands, f32 accumulation / BN math).
# --------------------------------------------------------------------------------------
def resblock_ref(x_ncl, params):
    N, Cin, L = x_ncl.shape

    x = jnp.transpose(x_ncl, (0, 2, 1)).astype(MM_DTYPE)            # (N, L, Cin) bf16
    xp = jnp.pad(x, ((0, 0), (1, 1), (0, 0)))

    def conv3(xpad, w_oik):                                          # w: (Cout, Cin, 3)
        w = jnp.transpose(w_oik, (2, 1, 0)).astype(MM_DTYPE)
        return sum(jnp.einsum('nlc,cd->nld', xpad[:, k:k + L, :], w[k],
                              preferred_element_type=jnp.float32) for k in range(3))

    def bnorm(v, g, b):
        mu = jnp.mean(v, axis=(0, 1), keepdims=True)
        var = jnp.mean((v - mu) ** 2, axis=(0, 1), keepdims=True)
        return (v - mu) * jax.lax.rsqrt(var + EPS) * g.reshape(1, 1, -1) + b.reshape(1, 1, -1)

    h = jnp.maximum(bnorm(conv3(xp, params['w1']), params['g1'], params['b1']), 0.0)
    hp = jnp.pad(h.astype(MM_DTYPE), ((0, 0), (1, 1), (0, 0)))
    y = bnorm(conv3(hp, params['w2']), params['g2'], params['b2'])
    wu = params['wu'][:, :, 0].T.astype(MM_DTYPE)
    up = bnorm(jnp.einsum('nlc,cd->nld', x, wu, preferred_element_type=jnp.float32),
               params['gu'], params['bu'])
    return jnp.transpose(jnp.maximum(y + up, 0.0), (0, 2, 1))


if __name__ == "__main__":
    N, Cin, Cout, L = 2, 4, 8, 16
    key = jax.random.PRNGKey(0)
    ks = jax.random.split(key, 10)

    params = {
        'w1': 0.1 * jax.random.normal(ks[0], (Cout, Cin, 3), jnp.float32),
        'w2': 0.1 * jax.random.normal(ks[1], (Cout, Cout, 3), jnp.float32),
        'wu': 0.1 * jax.random.normal(ks[2], (Cout, Cin, 1), jnp.float32),
        'g1': 1.0 + 0.1 * jax.random.normal(ks[3], (Cout,), jnp.float32),
        'b1': 0.1 * jax.random.normal(ks[4], (Cout,), jnp.float32),
        'g2': 1.0 + 0.1 * jax.random.normal(ks[5], (Cout,), jnp.float32),
        'b2': 0.1 * jax.random.normal(ks[6], (Cout,), jnp.float32),
        'gu': 1.0 + 0.1 * jax.random.normal(ks[7], (Cout,), jnp.float32),
        'bu': 0.1 * jax.random.normal(ks[8], (Cout,), jnp.float32),
    }
    x = jax.random.normal(ks[9], (N, Cin, L), jnp.float32)

    fwd = jax.jit(resblock_forward)
    out = jax.block_until_ready(fwd(x, params))
    ref = jax.block_until_ready(resblock_ref(x, params))

    assert out.shape == (N, Cout, L)
    assert jnp.allclose(out, ref, atol=1e-3, rtol=1e-3), "mismatch vs reference"
    print("KERNEL_OK")
</pallas_src>

<mosaic_0001>
module attributes {stable_mosaic.version = 11 : i64} {
  func.func @_conv1_up_kernel(%arg0: i32, %arg1: memref<1x16x128xbf16, #tpu.memory_space<vmem>>, %arg2: memref<384x256xbf16, #tpu.memory_space<vmem>>, %arg3: memref<1x16x256xf32, #tpu.memory_space<vmem>>, %arg4: memref<1x256xf32, #tpu.memory_space<vmem>>, %arg5: memref<1x256xf32, #tpu.memory_space<vmem>>, %arg6: memref<16x384xf32, #tpu.memory_space<vmem>>) attributes {dimension_semantics = [#tpu.dimension_semantics<arbitrary>], iteration_bounds = array<i64: 2>, scalar_prefetch = 0 : i64, scratch_operands = 1 : i64, tpu.core_type = #tpu.core_type<tc>, window_params = [{transform_indices = @transform_0, window_bounds = array<i64: 1, 16, 128>}, {pipeline_mode = #tpu.pipeline_mode<synchronous>, transform_indices = @transform_1, window_bounds = array<i64: 384, 256>}, {transform_indices = @transform_2, window_bounds = array<i64: 1, 16, 256>}, {pipeline_mode = #tpu.pipeline_mode<synchronous>, transform_indices = @transform_3, window_bounds = array<i64: 1, 256>}, {pipeline_mode = #tpu.pipeline_mode<synchronous>, transform_indices = @transform_4, window_bounds = array<i64: 1, 256>}]} {
    %c0_i32 = arith.constant 0 : i32
    %0 = arith.cmpi eq, %arg0, %c0_i32 : i32
    %1 = arith.extui %0 : i1 to i32
    %c0_i32_0 = arith.constant 0 : i32
    %2 = arith.cmpi ne, %1, %c0_i32_0 : i32
    scf.if %2 {
      %cst_23 = arith.constant 0.000000e+00 : f32
      %29 = vector.broadcast %cst_23 : f32 to vector<1x256xf32>
      %c0_24 = arith.constant 0 : index
      %c0_25 = arith.constant 0 : index
      %30 = vector.load %arg4[%c0_24, %c0_25] : memref<1x256xf32, #tpu.memory_space<vmem>>, vector<1x256xf32>
      tpu.vector_store %arg4[%c0_24, %c0_25], %29 {strides = array<i32>} : memref<1x256xf32, #tpu.memory_space<vmem>>, vector<1x256xf32>,
      %cst_26 = arith.constant 0.000000e+00 : f32
      %31 = vector.broadcast %cst_26 : f32 to vector<1x256xf32>
      %c0_27 = arith.constant 0 : index
      %c0_28 = arith.constant 0 : index
      %32 = vector.load %arg5[%c0_27, %c0_28] : memref<1x256xf32, #tpu.memory_space<vmem>>, vector<1x256xf32>
      tpu.vector_store %arg5[%c0_27, %c0_28], %31 {strides = array<i32>} : memref<1x256xf32, #tpu.memory_space<vmem>>, vector<1x256xf32>,
      %cst_29 = arith.constant 0.000000e+00 : f32
      %33 = vector.broadcast %cst_29 : f32 to vector<16x384xf32>
      %c0_30 = arith.constant 0 : index
      %c0_31 = arith.constant 0 : index
      %34 = vector.load %arg6[%c0_30, %c0_31] : memref<16x384xf32, #tpu.memory_space<vmem>>, vector<16x384xf32>
      tpu.vector_store %arg6[%c0_30, %c0_31], %33 {strides = array<i32>} : memref<16x384xf32, #tpu.memory_space<vmem>>, vector<16x384xf32>,
    } else {
    }
    %c0 = arith.constant 0 : index
    %c0_1 = arith.constant 0 : index
    %c0_2 = arith.constant 0 : index
    %3 = vector.load %arg1[%c0, %c0_1, %c0_2] : memref<1x16x128xbf16, #tpu.memory_space<vmem>>, vector<1x16x128xbf16>
    %4 = vector.shape_cast %3 : vector<1x16x128xbf16> to vector<16x128xbf16>
    %5 = arith.extf %4 : vector<16x128xbf16> to vector<16x128xf32>
    %6 = vector.extract_strided_slice %5 {offsets = [0, 0], sizes = [15, 128], strides = [1, 1]} : vector<16x128xf32> to vector<15x128xf32>
    %c1 = arith.constant 1 : index
    %c0_3 = arith.constant 0 : index
    %7 = vector.load %arg6[%c1, %c0_3] : memref<16x384xf32, #tpu.memory_space<vmem>>, vector<15x128xf32>
    tpu.vector_store %arg6[%c1, %c0_3], %6 {strides = array<i32>} : memref<16x384xf32, #tpu.memory_space<vmem>>, vector<15x128xf32>,
    %c0_4 = arith.constant 0 : index
    %c128 = arith.constant 128 : index
    %8 = vector.load %arg6[%c0_4, %c128] : memref<16x384xf32, #tpu.memory_space<vmem>>, vector<16x128xf32>
    tpu.vector_store %arg6[%c0_4, %c128], %5 {strides = array<i32>} : memref<16x384xf32, #tpu.memory_space<vmem>>, vector<16x128xf32>,
    %9 = vector.extract_strided_slice %5 {offsets = [1, 0], sizes = [15, 128], strides = [1, 1]} : vector<16x128xf32> to vector<15x128xf32>
    %c0_5 = arith.constant 0 : index
    %c256 = arith.constant 256 : index
    %10 = vector.load %arg6[%c0_5, %c256] : memref<16x384xf32, #tpu.memory_space<vmem>>, vector<15x128xf32>
    tpu.vector_store %arg6[%c0_5, %c256], %9 {strides = array<i32>} : memref<16x384xf32, #tpu.memory_space<vmem>>, vector<15x128xf32>,
    %c0_6 = arith.constant 0 : index
    %c0_7 = arith.constant 0 : index
    %11 = vector.load %arg6[%c0_6, %c0_7] : memref<16x384xf32, #tpu.memory_space<vmem>>, vector<16x384xf32>
    %12 = arith.truncf %11 : vector<16x384xf32> to vector<16x384xbf16>
    %c0_8 = arith.constant 0 : index
    %c0_9 = arith.constant 0 : index
    %13 = vector.load %arg2[%c0_8, %c0_9] : memref<384x256xbf16, #tpu.memory_space<vmem>>, vector<384x256xbf16>
    %cst = arith.constant dense<0.000000e+00> : vector<16x256xf32>
    %14 = tpu.matmul %12, %13, %cst {dimension_numbers = #tpu.dot_dimension_numbers<[1], [0], [0], [1], [0, 0, 1, 1], [], []>} : vector<16x384xbf16>, vector<384x256xbf16>, vector<16x256xf32> -> vector<16x256xf32>
    %c0_10 = arith.constant 0 : index
    %c0_11 = arith.constant 0 : index
    %c0_12 = arith.constant 0 : index
    %15 = vector.load %arg3[%c0_10, %c0_11, %c0_12] : memref<1x16x256xf32, #tpu.memory_space<vmem>>, vector<1x16x256xf32>
    %16 = vector.shape_cast %15 : vector<1x16x256xf32> to vector<16x256xf32>
    %17 = vector.shape_cast %14 : vector<16x256xf32> to vector<1x16x256xf32>
    tpu.vector_store %arg3[%c0_10, %c0_11, %c0_12], %17 {strides = array<i32>} : memref<1x16x256xf32, #tpu.memory_space<vmem>>, vector<1x16x256xf32>,
    %c0_13 = arith.constant 0 : index
    %c0_14 = arith.constant 0 : index
    %18 = vector.load %arg4[%c0_13, %c0_14] : memref<1x256xf32, #tpu.memory_space<vmem>>, vector<1x256xf32>
    %cst_15 = arith.constant dense<0.000000e+00> : vector<256xf32>
    %19 = vector.multi_reduction <add>, %14, %cst_15 [0] : vector<16x256xf32> to vector<256xf32>
    %20 = vector.shape_cast %19 : vector<256xf32> to vector<1x256xf32>
    %21 = arith.addf %18, %20 : vector<1x256xf32>
    %c0_16 = arith.constant 0 : index
    %c0_17 = arith.constant 0 : index
    %22 = vector.load %arg4[%c0_16, %c0_17] : memref<1x256xf32, #tpu.memory_space<vmem>>, vector<1x256xf32>
    tpu.vector_store %arg4[%c0_16, %c0_17], %21 {strides = array<i32>} : memref<1x256xf32, #tpu.memory_space<vmem>>, vector<1x256xf32>,
    %c0_18 = arith.constant 0 : index
    %c0_19 = arith.constant 0 : index
    %23 = vector.load %arg5[%c0_18, %c0_19] : memref<1x256xf32, #tpu.memory_space<vmem>>, vector<1x256xf32>
    %24 = arith.mulf %14, %14 : vector<16x256xf32>
    %cst_20 = arith.constant dense<0.000000e+00> : vector<256xf32>
    %25 = vector.multi_reduction <add>, %24, %cst_20 [0] : vector<16x256xf32> to vector<256xf32>
    %26 = vector.shape_cast %25 : vector<256xf32> to vector<1x256xf32>
    %27 = arith.addf %23, %26 : vector<1x256xf32>
    %c0_21 = arith.constant 0 : index
    %c0_22 = arith.constant 0 : index
    %28 = vector.load %arg5[%c0_21, %c0_22] : memref<1x256xf32, #tpu.memory_space<vmem>>, vector<1x256xf32>
    tpu.vector_store %arg5[%c0_21, %c0_22], %27 {strides = array<i32>} : memref<1x256xf32, #tpu.memory_space<vmem>>, vector<1x256xf32>,
    return
  }
  func.func @transform_0(%arg0: i32) -> (i32, i32, i32) {
    %c0_i32 = arith.constant 0 : i32
    %c0_i32_0 = arith.constant 0 : i32
    %c0_i32_1 = arith.constant 0 : i32
    return %arg0, %c0_i32, %c0_i32_0 : i32, i32, i32
  }
  func.func @transform_1(%arg0: i32) -> (i32, i32) {
    %c0_i32 = arith.constant 0 : i32
    %c0_i32_0 = arith.constant 0 : i32
    %c0_i32_1 = arith.constant 0 : i32
    return %c0_i32, %c0_i32_0 : i32, i32
  }
  func.func @transform_2(%arg0: i32) -> (i32, i32, i32) {
    %c0_i32 = arith.constant 0 : i32
    %c0_i32_0 = arith.constant 0 : i32
    %c0_i32_1 = arith.constant 0 : i32
    return %arg0, %c0_i32, %c0_i32_0 : i32, i32, i32
  }
  func.func @transform_3(%arg0: i32) -> (i32, i32) {
    %c0_i32 = arith.constant 0 : i32
    %c0_i32_0 = arith.constant 0 : i32
    %c0_i32_1 = arith.constant 0 : i32
    return %c0_i32, %c0_i32_0 : i32, i32
  }
  func.func @transform_4(%arg0: i32) -> (i32, i32) {
    %c0_i32 = arith.constant 0 : i32
    %c0_i32_0 = arith.constant 0 : i32
    %c0_i32_1 = arith.constant 0 : i32
    return %c0_i32, %c0_i32_0 : i32, i32
  }
}

module attributes {stable_mosaic.version = 11 : i64} {
  func.func @_bn1_relu_conv2_kernel(%arg0: i32, %arg1: memref<1x16x128xf32, #tpu.memory_space<vmem>>, %arg2: memref<1x128xf32, #tpu.memory_space<vmem>>, %arg3: memref<1x128xf32, #tpu.memory_space<vmem>>, %arg4: memref<6x128xf32, #tpu.memory_space<vmem>>, %arg5: memref<384x128xbf16, #tpu.memory_space<vmem>>, %arg6: memref<1x16x128xf32, #tpu.memory_space<vmem>>, %arg7: memref<1x128xf32, #tpu.memory_space<vmem>>, %arg8: memref<1x128xf32, #tpu.memory_space<vmem>>, %arg9: memref<16x384xf32, #tpu.memory_space<vmem>>) attributes {dimension_semantics = [#tpu.dimension_semantics<arbitrary>], iteration_bounds = array<i64: 2>, scalar_prefetch = 0 : i64, scratch_operands = 1 : i64, tpu.core_type = #tpu.core_type<tc>, window_params = [{transform_indices = @transform_0, window_bounds = array<i64: 1, 16, 128>}, {transform_indices = @transform_1, window_bounds = array<i64: 1, 128>}, {transform_indices = @transform_2, window_bounds = array<i64: 1, 128>}, {pipeline_mode = #tpu.pipeline_mode<synchronous>, transform_indices = @transform_3, window_bounds = array<i64: 6, 128>}, {pipeline_mode = #tpu.pipeline_mode<synchronous>, transform_indices = @transform_4, window_bounds = array<i64: 384, 128>}, {transform_indices = @transform_5, window_bounds = array<i64: 1, 16, 128>}, {pipeline_mode = #tpu.pipeline_mode<synchronous>, transform_indices = @transform_6, window_bounds = array<i64: 1, 128>}, {pipeline_mode = #tpu.pipeline_mode<synchronous>, transform_indices = @transform_7, window_bounds = array<i64: 1, 128>}]} {
    %c0_i32 = arith.constant 0 : i32
    %0 = arith.cmpi eq, %arg0, %c0_i32 : i32
    %1 = arith.extui %0 : i1 to i32
    %c0_i32_0 = arith.constant 0 : i32
    %2 = arith.cmpi ne, %1, %c0_i32_0 : i32
    scf.if %2 {
      %cst_35 = arith.constant 0.000000e+00 : f32
      %50 = vector.broadcast %cst_35 : f32 to vector<1x128xf32>
      %c0_36 = arith.constant 0 : index
      %c0_37 = arith.constant 0 : index
      %51 = vector.load %arg7[%c0_36, %c0_37] : memref<1x128xf32, #tpu.memory_space<vmem>>, vector<1x128xf32>
      tpu.vector_store %arg7[%c0_36, %c0_37], %50 {strides = array<i32>} : memref<1x128xf32, #tpu.memory_space<vmem>>, vector<1x128xf32>,
      %cst_38 = arith.constant 0.000000e+00 : f32
      %52 = vector.broadcast %cst_38 : f32 to vector<1x128xf32>
      %c0_39 = arith.constant 0 : index
      %c0_40 = arith.constant 0 : index
      %53 = vector.load %arg8[%c0_39, %c0_40] : memref<1x128xf32, #tpu.memory_space<vmem>>, vector<1x128xf32>
      tpu.vector_store %arg8[%c0_39, %c0_40], %52 {strides = array<i32>} : memref<1x128xf32, #tpu.memory_space<vmem>>, vector<1x128xf32>,
      %cst_41 = arith.constant 0.000000e+00 : f32
      %54 = vector.broadcast %cst_41 : f32 to vector<16x384xf32>
      %c0_42 = arith.constant 0 : index
      %c0_43 = arith.constant 0 : index
      %55 = vector.load %arg9[%c0_42, %c0_43] : memref<16x384xf32, #tpu.memory_space<vmem>>, vector<16x384xf32>
      tpu.vector_store %arg9[%c0_42, %c0_43], %54 {strides = array<i32>} : memref<16x384xf32, #tpu.memory_space<vmem>>, vector<16x384xf32>,
    } else {
    }
    %c0 = arith.constant 0 : index
    %c0_1 = arith.constant 0 : index
    %3 = vector.load %arg2[%c0, %c0_1] : memref<1x128xf32, #tpu.memory_space<vmem>>, vector<1x128xf32>
    %cst = arith.constant 3.125000e-02 : f32
    %4 = vector.broadcast %cst : f32 to vector<1x128xf32>
    %5 = arith.mulf %3, %4 : vector<1x128xf32>
    %c0_2 = arith.constant 0 : index
    %c0_3 = arith.constant 0 : index
    %6 = vector.load %arg3[%c0_2, %c0_3] : memref<1x128xf32, #tpu.memory_space<vmem>>, vector<1x128xf32>
    %cst_4 = arith.constant 3.125000e-02 : f32
    %7 = vector.broadcast %cst_4 : f32 to vector<1x128xf32>
    %8 = arith.mulf %6, %7 : vector<1x128xf32>
    %9 = arith.mulf %5, %5 : vector<1x128xf32>
    %10 = arith.subf %8, %9 : vector<1x128xf32>
    %c0_5 = arith.constant 0 : index
    %c0_6 = arith.constant 0 : index
    %11 = vector.load %arg4[%c0_5, %c0_6] : memref<6x128xf32, #tpu.memory_space<vmem>>, vector<1x128xf32>
    %cst_7 = arith.constant 9.99999974E-6 : f32
    %12 = vector.broadcast %cst_7 : f32 to vector<1x128xf32>
    %13 = arith.addf %10, %12 : vector<1x128xf32>
    %14 = math.rsqrt %13 : vector<1x128xf32>
    %15 = arith.mulf %11, %14 : vector<1x128xf32>
    %c1 = arith.constant 1 : index
    %c0_8 = arith.constant 0 : index
    %16 = vector.load %arg4[%c1, %c0_8] : memref<6x128xf32, #tpu.memory_space<vmem>>, vector<1x128xf32>
    %17 = arith.mulf %5, %15 : vector<1x128xf32>
    %18 = arith.subf %16, %17 : vector<1x128xf32>
    %c0_9 = arith.constant 0 : index
    %c0_10 = arith.constant 0 : index
    %c0_11 = arith.constant 0 : index
    %19 = vector.load %arg1[%c0_9, %c0_10, %c0_11] : memref<1x16x128xf32, #tpu.memory_space<vmem>>, vector<1x16x128xf32>
    %20 = vector.shape_cast %19 : vector<1x16x128xf32> to vector<16x128xf32>
    %21 = vector.broadcast %15 : vector<1x128xf32> to vector<16x128xf32>
    %22 = arith.mulf %20, %21 : vector<16x128xf32>
    %23 = vector.broadcast %18 : vector<1x128xf32> to vector<16x128xf32>
    %24 = arith.addf %22, %23 : vector<16x128xf32>
    %cst_12 = arith.constant 0.000000e+00 : f32
    %25 = vector.broadcast %cst_12 : f32 to vector<16x128xf32>
    %26 = arith.maximumf %24, %25 : vector<16x128xf32>
    %27 = vector.extract_strided_slice %26 {offsets = [0, 0], sizes = [15, 128], strides = [1, 1]} : vector<16x128xf32> to vector<15x128xf32>
    %c1_13 = arith.constant 1 : index
    %c0_14 = arith.constant 0 : index
    %28 = vector.load %arg9[%c1_13, %c0_14] : memref<16x384xf32, #tpu.memory_space<vmem>>, vector<15x128xf32>
    tpu.vector_store %arg9[%c1_13, %c0_14], %27 {strides = array<i32>} : memref<16x384xf32, #tpu.memory_space<vmem>>, vector<15x128xf32>,
    %c0_15 = arith.constant 0 : index
    %c128 = arith.constant 128 : index
    %29 = vector.load %arg9[%c0_15, %c128] : memref<16x384xf32, #tpu.memory_space<vmem>>, vector<16x128xf32>
    tpu.vector_store %arg9[%c0_15, %c128], %26 {strides = array<i32>} : memref<16x384xf32, #tpu.memory_space<vmem>>, vector<16x128xf32>,
    %30 = vector.extract_strided_slice %26 {offsets = [1, 0], sizes = [15, 128], strides = [1, 1]} : vector<16x128xf32> to vector<15x128xf32>
    %c0_16 = arith.constant 0 : index
    %c256 = arith.constant 256 : index
    %31 = vector.load %arg9[%c0_16, %c256] : memref<16x384xf32, #tpu.memory_space<vmem>>, vector<15x128xf32>
    tpu.vector_store %arg9[%c0_16, %c256], %30 {strides = array<i32>} : memref<16x384xf32, #tpu.memory_space<vmem>>, vector<15x128xf32>,
    %c0_17 = arith.constant 0 : index
    %c0_18 = arith.constant 0 : index
    %32 = vector.load %arg9[%c0_17, %c0_18] : memref<16x384xf32, #tpu.memory_space<vmem>>, vector<16x384xf32>
    %33 = arith.truncf %32 : vector<16x384xf32> to vector<16x384xbf16>
    %c0_19 = arith.constant 0 : index
    %c0_20 = arith.constant 0 : index
    %34 = vector.load %arg5[%c0_19, %c0_20] : memref<384x128xbf16, #tpu.memory_space<vmem>>, vector<384x128xbf16>
    %cst_21 = arith.constant dense<0.000000e+00> : vector<16x128xf32>
    %35 = tpu.matmul %33, %34, %cst_21 {dimension_numbers = #tpu.dot_dimension_numbers<[1], [0], [0], [1], [0, 0, 1, 1], [], []>} : vector<16x384xbf16>, vector<384x128xbf16>, vector<16x128xf32> -> vector<16x128xf32>
    %c0_22 = arith.constant 0 : index
    %c0_23 = arith.constant 0 : index
    %c0_24 = arith.constant 0 : index
    %36 = vector.load %arg6[%c0_22, %c0_23, %c0_24] : memref<1x16x128xf32, #tpu.memory_space<vmem>>, vector<1x16x128xf32>
    %37 = vector.shape_cast %36 : vector<1x16x128xf32> to vector<16x128xf32>
    %38 = vector.shape_cast %35 : vector<16x128xf32> to vector<1x16x128xf32>
    tpu.vector_store %arg6[%c0_22, %c0_23, %c0_24], %38 {strides = array<i32>} : memref<1x16x128xf32, #tpu.memory_space<vmem>>, vector<1x16x128xf32>,
    %c0_25 = arith.constant 0 : index
    %c0_26 = arith.constant 0 : index
    %39 = vector.load %arg7[%c0_25, %c0_26] : memref<1x128xf32, #tpu.memory_space<vmem>>, vector<1x128xf32>
    %cst_27 = arith.constant dense<0.000000e+00> : vector<128xf32>
    %40 = vector.multi_reduction <add>, %35, %cst_27 [0] : vector<16x128xf32> to vector<128xf32>
    %41 = vector.shape_cast %40 : vector<128xf32> to vector<1x128xf32>
    %42 = arith.addf %39, %41 : vector<1x128xf32>
    %c0_28 = arith.constant 0 : index
    %c0_29 = arith.constant 0 : index
    %43 = vector.load %arg7[%c0_28, %c0_29] : memref<1x128xf32, #tpu.memory_space<vmem>>, vector<1x128xf32>
    tpu.vector_store %arg7[%c0_28, %c0_29], %42 {strides = array<i32>} : memref<1x128xf32, #tpu.memory_space<vmem>>, vector<1x128xf32>,
    %c0_30 = arith.constant 0 : index
    %c0_31 = arith.constant 0 : index
    %44 = vector.load %arg8[%c0_30, %c0_31] : memref<1x128xf32, #tpu.memory_space<vmem>>, vector<1x128xf32>
    %45 = arith.mulf %35, %35 : vector<16x128xf32>
    %cst_32 = arith.constant dense<0.000000e+00> : vector<128xf32>
    %46 = vector.multi_reduction <add>, %45, %cst_32 [0] : vector<16x128xf32> to vector<128xf32>
    %47 = vector.shape_cast %46 : vector<128xf32> to vector<1x128xf32>
    %48 = arith.addf %44, %47 : vector<1x128xf32>
    %c0_33 = arith.constant 0 : index
    %c0_34 = arith.constant 0 : index
    %49 = vector.load %arg8[%c0_33, %c0_34] : memref<1x128xf32, #tpu.memory_space<vmem>>, vector<1x128xf32>
    tpu.vector_store %arg8[%c0_33, %c0_34], %48 {strides = array<i32>} : memref<1x128xf32, #tpu.memory_space<vmem>>, vector<1x128xf32>,
    return
  }
  func.func @transform_0(%arg0: i32) -> (i32, i32, i32) {
    %c0_i32 = arith.constant 0 : i32
    %c0_i32_0 = arith.constant 0 : i32
    %c0_i32_1 = arith.constant 0 : i32
    return %arg0, %c0_i32, %c0_i32_0 : i32, i32, i32
  }
  func.func @transform_1(%arg0: i32) -> (i32, i32) {
    %c0_i32 = arith.constant 0 : i32
    %c0_i32_0 = arith.constant 0 : i32
    %c0_i32_1 = arith.constant 0 : i32
    return %c0_i32, %c0_i32_0 : i32, i32
  }
  func.func @transform_2(%arg0: i32) -> (i32, i32) {
    %c0_i32 = arith.constant 0 : i32
    %c0_i32_0 = arith.constant 0 : i32
    %c0_i32_1 = arith.constant 0 : i32
    return %c0_i32, %c0_i32_0 : i32, i32
  }
  func.func @transform_3(%arg0: i32) -> (i32, i32) {
    %c0_i32 = arith.constant 0 : i32
    %c0_i32_0 = arith.constant 0 : i32
    %c0_i32_1 = arith.constant 0 : i32
    return %c0_i32, %c0_i32_0 : i32, i32
  }
  func.func @transform_4(%arg0: i32) -> (i32, i32) {
    %c0_i32 = arith.constant 0 : i32
    %c0_i32_0 = arith.constant 0 : i32
    %c0_i32_1 = arith.constant 0 : i32
    return %c0_i32, %c0_i32_0 : i32, i32
  }
  func.func @transform_5(%arg0: i32) -> (i32, i32, i32) {
    %c0_i32 = arith.constant 0 : i32
    %c0_i32_0 = arith.constant 0 : i32
    %c0_i32_1 = arith.constant 0 : i32
    return %arg0, %c0_i32, %c0_i32_0 : i32, i32, i32
  }
  func.func @transform_6(%arg0: i32) -> (i32, i32) {
    %c0_i32 = arith.constant 0 : i32
    %c0_i32_0 = arith.constant 0 : i32
    %c0_i32_1 = arith.constant 0 : i32
    return %c0_i32, %c0_i32_0 : i32, i32
  }
  func.func @transform_7(%arg0: i32) -> (i32, i32) {
    %c0_i32 = arith.constant 0 : i32
    %c0_i32_0 = arith.constant 0 : i32
    %c0_i32_1 = arith.constant 0 : i32
    return %c0_i32, %c0_i32_0 : i32, i32
  }
}

module attributes {stable_mosaic.version = 11 : i64} {
  func.func @_finalize_kernel(%arg0: i32, %arg1: memref<1x16x128xf32, #tpu.memory_space<vmem>>, %arg2: memref<1x16x128xf32, #tpu.memory_space<vmem>>, %arg3: memref<1x128xf32, #tpu.memory_space<vmem>>, %arg4: memref<1x128xf32, #tpu.memory_space<vmem>>, %arg5: memref<1x128xf32, #tpu.memory_space<vmem>>, %arg6: memref<1x128xf32, #tpu.memory_space<vmem>>, %arg7: memref<6x128xf32, #tpu.memory_space<vmem>>, %arg8: memref<1x16x128xf32, #tpu.memory_space<vmem>>) attributes {dimension_semantics = [#tpu.dimension_semantics<parallel>], iteration_bounds = array<i64: 2>, scalar_prefetch = 0 : i64, scratch_operands = 0 : i64, tpu.core_type = #tpu.core_type<tc>, window_params = [{transform_indices = @transform_0, window_bounds = array<i64: 1, 16, 128>}, {transform_indices = @transform_1, window_bounds = array<i64: 1, 16, 128>}, {pipeline_mode = #tpu.pipeline_mode<synchronous>, transform_indices = @transform_2, window_bounds = array<i64: 1, 128>}, {pipeline_mode = #tpu.pipeline_mode<synchronous>, transform_indices = @transform_3, window_bounds = array<i64: 1, 128>}, {transform_indices = @transform_4, window_bounds = array<i64: 1, 128>}, {transform_indices = @transform_5, window_bounds = array<i64: 1, 128>}, {pipeline_mode = #tpu.pipeline_mode<synchronous>, transform_indices = @transform_6, window_bounds = array<i64: 6, 128>}, {transform_indices = @transform_7, window_bounds = array<i64: 1, 16, 128>}]} {
    %c0 = arith.constant 0 : index
    %c0_0 = arith.constant 0 : index
    %0 = vector.load %arg3[%c0, %c0_0] : memref<1x128xf32, #tpu.memory_space<vmem>>, vector<1x128xf32>
    %cst = arith.constant 3.125000e-02 : f32
    %1 = vector.broadcast %cst : f32 to vector<1x128xf32>
    %2 = arith.mulf %0, %1 : vector<1x128xf32>
    %c0_1 = arith.constant 0 : index
    %c0_2 = arith.constant 0 : index
    %3 = vector.load %arg4[%c0_1, %c0_2] : memref<1x128xf32, #tpu.memory_space<vmem>>, vector<1x128xf32>
    %cst_3 = arith.constant 3.125000e-02 : f32
    %4 = vector.broadcast %cst_3 : f32 to vector<1x128xf32>
    %5 = arith.mulf %3, %4 : vector<1x128xf32>
    %6 = arith.mulf %2, %2 : vector<1x128xf32>
    %7 = arith.subf %5, %6 : vector<1x128xf32>
    %c2 = arith.constant 2 : index
    %c0_4 = arith.constant 0 : index
    %8 = vector.load %arg7[%c2, %c0_4] : memref<6x128xf32, #tpu.memory_space<vmem>>, vector<1x128xf32>
    %cst_5 = arith.constant 9.99999974E-6 : f32
    %9 = vector.broadcast %cst_5 : f32 to vector<1x128xf32>
    %10 = arith.addf %7, %9 : vector<1x128xf32>
    %11 = math.rsqrt %10 : vector<1x128xf32>
    %12 = arith.mulf %8, %11 : vector<1x128xf32>
    %c3 = arith.constant 3 : index
    %c0_6 = arith.constant 0 : index
    %13 = vector.load %arg7[%c3, %c0_6] : memref<6x128xf32, #tpu.memory_space<vmem>>, vector<1x128xf32>
    %14 = arith.mulf %2, %12 : vector<1x128xf32>
    %15 = arith.subf %13, %14 : vector<1x128xf32>
    %c0_7 = arith.constant 0 : index
    %c0_8 = arith.constant 0 : index
    %16 = vector.load %arg5[%c0_7, %c0_8] : memref<1x128xf32, #tpu.memory_space<vmem>>, vector<1x128xf32>
    %cst_9 = arith.constant 3.125000e-02 : f32
    %17 = vector.broadcast %cst_9 : f32 to vector<1x128xf32>
    %18 = arith.mulf %16, %17 : vector<1x128xf32>
    %c0_10 = arith.constant 0 : index
    %c0_11 = arith.constant 0 : index
    %19 = vector.load %arg6[%c0_10, %c0_11] : memref<1x128xf32, #tpu.memory_space<vmem>>, vector<1x128xf32>
    %cst_12 = arith.constant 3.125000e-02 : f32
    %20 = vector.broadcast %cst_12 : f32 to vector<1x128xf32>
    %21 = arith.mulf %19, %20 : vector<1x128xf32>
    %22 = arith.mulf %18, %18 : vector<1x128xf32>
    %23 = arith.subf %21, %22 : vector<1x128xf32>
    %c4 = arith.constant 4 : index
    %c0_13 = arith.constant 0 : index
    %24 = vector.load %arg7[%c4, %c0_13] : memref<6x128xf32, #tpu.memory_space<vmem>>, vector<1x128xf32>
    %cst_14 = arith.constant 9.99999974E-6 : f32
    %25 = vector.broadcast %cst_14 : f32 to vector<1x128xf32>
    %26 = arith.addf %23, %25 : vector<1x128xf32>
    %27 = math.rsqrt %26 : vector<1x128xf32>
    %28 = arith.mulf %24, %27 : vector<1x128xf32>
    %c5 = arith.constant 5 : index
    %c0_15 = arith.constant 0 : index
    %29 = vector.load %arg7[%c5, %c0_15] : memref<6x128xf32, #tpu.memory_space<vmem>>, vector<1x128xf32>
    %30 = arith.mulf %18, %28 : vector<1x128xf32>
    %31 = arith.subf %29, %30 : vector<1x128xf32>
    %c0_16 = arith.constant 0 : index
    %c0_17 = arith.constant 0 : index
    %c0_18 = arith.constant 0 : index
    %32 = vector.load %arg1[%c0_16, %c0_17, %c0_18] : memref<1x16x128xf32, #tpu.memory_space<vmem>>, vector<1x16x128xf32>
    %33 = vector.shape_cast %32 : vector<1x16x128xf32> to vector<16x128xf32>
    %34 = vector.broadcast %12 : vector<1x128xf32> to vector<16x128xf32>
    %35 = arith.mulf %33, %34 : vector<16x128xf32>
    %36 = vector.broadcast %15 : vector<1x128xf32> to vector<16x128xf32>
    %37 = arith.addf %35, %36 : vector<16x128xf32>
    %c0_19 = arith.constant 0 : index
    %c0_20 = arith.constant 0 : index
    %c0_21 = arith.constant 0 : index
    %38 = vector.load %arg2[%c0_19, %c0_20, %c0_21] : memref<1x16x128xf32, #tpu.memory_space<vmem>>, vector<1x16x128xf32>
    %39 = vector.shape_cast %38 : vector<1x16x128xf32> to vector<16x128xf32>
    %40 = vector.broadcast %28 : vector<1x128xf32> to vector<16x128xf32>
    %41 = arith.mulf %39, %40 : vector<16x128xf32>
    %42 = vector.broadcast %31 : vector<1x128xf32> to vector<16x128xf32>
    %43 = arith.addf %41, %42 : vector<16x128xf32>
    %44 = arith.addf %37, %43 : vector<16x128xf32>
    %cst_22 = arith.constant 0.000000e+00 : f32
    %45 = vector.broadcast %cst_22 : f32 to vector<16x128xf32>
    %46 = arith.maximumf %44, %45 : vector<16x128xf32>
    %c0_23 = arith.constant 0 : index
    %c0_24 = arith.constant 0 : index
    %c0_25 = arith.constant 0 : index
    %47 = vector.load %arg8[%c0_23, %c0_24, %c0_25] : memref<1x16x128xf32, #tpu.memory_space<vmem>>, vector<1x16x128xf32>
    %48 = vector.shape_cast %47 : vector<1x16x128xf32> to vector<16x128xf32>
    %49 = vector.shape_cast %46 : vector<16x128xf32> to vector<1x16x128xf32>
    tpu.vector_store %arg8[%c0_23, %c0_24, %c0_25], %49 {strides = array<i32>} : memref<1x16x128xf32, #tpu.memory_space<vmem>>, vector<1x16x128xf32>,
    return
  }
  func.func @transform_0(%arg0: i32) -> (i32, i32, i32) {
    %c0_i32 = arith.constant 0 : i32
    %c0_i32_0 = arith.constant 0 : i32
    %c0_i32_1 = arith.constant 0 : i32
    return %arg0, %c0_i32, %c0_i32_0 : i32, i32, i32
  }
  func.func @transform_1(%arg0: i32) -> (i32, i32, i32) {
    %c0_i32 = arith.constant 0 : i32
    %c1_i32 = arith.constant 1 : i32
    %c0_i32_0 = arith.constant 0 : i32
    return %arg0, %c0_i32, %c1_i32 : i32, i32, i32
  }
  func.func @transform_2(%arg0: i32) -> (i32, i32) {
    %c0_i32 = arith.constant 0 : i32
    %c0_i32_0 = arith.constant 0 : i32
    %c0_i32_1 = arith.constant 0 : i32
    return %c0_i32, %c0_i32_0 : i32, i32
  }
  func.func @transform_3(%arg0: i32) -> (i32, i32) {
    %c0_i32 = arith.constant 0 : i32
    %c0_i32_0 = arith.constant 0 : i32
    %c0_i32_1 = arith.constant 0 : i32
    return %c0_i32, %c0_i32_0 : i32, i32
  }
  func.func @transform_4(%arg0: i32) -> (i32, i32) {
    %c0_i32 = arith.constant 0 : i32
    %c1_i32 = arith.constant 1 : i32
    %c0_i32_0 = arith.constant 0 : i32
    return %c0_i32, %c1_i32 : i32, i32
  }
  func.func @transform_5(%arg0: i32) -> (i32, i32) {
    %c0_i32 = arith.constant 0 : i32
    %c1_i32 = arith.constant 1 : i32
    %c0_i32_0 = arith.constant 0 : i32
    return %c0_i32, %c1_i32 : i32, i32
  }
  func.func @transform_6(%arg0: i32) -> (i32, i32) {
    %c0_i32 = arith.constant 0 : i32
    %c0_i32_0 = arith.constant 0 : i32
    %c0_i32_1 = arith.constant 0 : i32
    return %c0_i32, %c0_i32_0 : i32, i32
  }
  func.func @transform_7(%arg0: i32) -> (i32, i32, i32) {
    %c0_i32 = arith.constant 0 : i32
    %c0_i32_0 = arith.constant 0 : i32
    %c0_i32_1 = arith.constant 0 : i32
    return %arg0, %c0_i32, %c0_i32_0 : i32, i32, i32
  }
}

</mosaic_0001>

<bundles_post_ra>
// kernel: resblock_forward.3
= control target key start
LH: loop header
LB: loop body
LE: loop exit
PB: predicated region body
PF: predicated region fallthrough
CT: control target
= control target key end

     0   :  { %s956_s15 = smov 0   ;;  %s1145_s0 = inlined_call_operand.vmem [shape: bf16[2,16,128], index: 0, kind: input, shape index: {}]   ;;  %s1146_s1 = inlined_call_operand.vmem [shape: bf16[384,256], index: 1, kind: input, shape index: {}]   ;;  %s1147_s2 = inlined_call_operand.vmem [shape: f32[2,16,256], index: 2, kind: output, shape index: {0}]   ;;  %s1148_s3 = inlined_call_operand.vmem [shape: f32[1,256], index: 3, kind: output, shape index: {1}]   ;;  %s1149_s4 = inlined_call_operand.vmem [shape: f32[1,256], index: 4, kind: output, shape index: {2}]  }
   0x1 LB: > { %s766_s16 = sadd.s32 4294967295, %s926_s15   ;;  %p770_p0 = scmp.ge.s32.totalorder %s926_s15, 1  ;;  %s926_s15 = sphi %s956_s15, %s15_s15  }
   0x2   : > { %p157_p1 = scmp.lt.s32.totalorder %s926_s15, 3 }
   0x4   : > { %p158_p2 = pnand %p770_p0, %p157_p1 }
   0x5   : > { %p183_p3 = scmp.lt.s32.totalorder (!%p158_p2), %s766_s16, 1  ;;  %p775_p4 = scmp.ne.s32.totalorder (!%p158_p2), %s766_s16, 0 }
   0x6   : > { %161 = sbr.rel (%p158_p2) target bundleno = 328 (0x148), region = 28 }
   0xd   : > { %s184_s17 = scalar_select %p183_p3, %s766_s16, 1 }
   0xe   : > { %197 = sbr.rel (%p775_p4) target bundleno = 21 (0x15), region = 32  ;;  %v198_v0 = vlaneseq (!%p775_p4)  ;;  %v928_v1 = vmov (!%p775_p4), 0.0  }
   0xf   : > { %s826_s18 = sshll.u32 %s184_s17, 3  ;;  %s827_s19 = sshll.u32 %s184_s17, 5  ;;  %204 = vst [vmem:[#allocation2] sm:$0xff] (!%p775_p4), %v928_v1  ;;  %209 = vst [vmem:[#allocation2 + $0x28] sm:$0xff] (!%p775_p4), %v928_v1 }
  0x10   : > { %s967_s22 = scalar_lea.vmem %s1145_s0, %s826_s18  ;;  %s972_s25 = scalar_lea.vmem %s1147_s2, %s827_s19  ;;  %vm200_vm0 = vcmp.lt.s32.totalorder (!%p775_p4), %v198_v0, 256 }
  0x11   : > { %202 = vst.msk [vmem:[%s1148_s3] sm:$0x3] (!%p775_p4), %vm200_vm0, %v928_v1  ;;  %203 = vst.msk [vmem:[%s1149_s4] sm:$0x3] (!%p775_p4), %vm200_vm0, %v928_v1 }
  0x15 PF: > { %v847_v2 = vld [vmem:[%s1146_s1 + $0x4] ss:$8 sps:$4 sm:$0xff]   ;;  %v849_v3 = vld [vmem:[%s1146_s1] ss:$8 sps:$4 sm:$0xff]   ;;  %v929_v4 = vmov 0   ;;  %vm226_vm1 = vcmask 1046528  }
  0x16   : > { %606 = vmatprep.mubr.bf16.mxu0 %v929_v4  ;;  %531 = vmatprep.subr.bf16.mxu1 %v847_v2  ;;  %v850_v5 = vld [vmem:[%s1146_s1 + $0x14] ss:$8 sps:$4 sm:$0xff]   ;;  %v852_v6 = vld [vmem:[%s1146_s1 + $0x10] ss:$8 sps:$4 sm:$0xff]   ;;  %v853_v7 = vld [vmem:[%s1146_s1 + $0x24] ss:$8 sps:$4 sm:$0xff]  }
  0x17   : > { %532 = vmatpush1.bf16.msra.mxu1 %v849_v3  ;;  %v855_v8 = vld [vmem:[%s1146_s1 + $0x20] ss:$8 sps:$4 sm:$0xff]   ;;  %v856_v9 = vld [vmem:[%s1146_s1 + $0x34] ss:$8 sps:$4 sm:$0xff]   ;;  %v858_v10 = vld [vmem:[%s1146_s1 + $0x30] ss:$8 sps:$4 sm:$0xff]  }
  0x18   : > { %533 = vmatprep.subr.bf16.mxu1 %v850_v5  ;;  %v871_v11 = vld [vmem:[%s1146_s1 + $0x104] ss:$8 sps:$4 sm:$0xff]   ;;  %v873_v12 = vld [vmem:[%s1146_s1 + $0x100] ss:$8 sps:$4 sm:$0xff]   ;;  %v877_v14 = vld [vmem:[%s1146_s1 + $0x114] ss:$8 sps:$4 sm:$0xff]  }
  0x19   : > { %v859_v13 = vld [vmem:[%s1146_s1 + $0x44] ss:$8 sps:$4 sm:$0xff]   ;;  %574 = vmatprep.subr.bf16.mxu0 %v871_v11  ;;  %v879_v15 = vld [vmem:[%s1146_s1 + $0x110] ss:$8 sps:$4 sm:$0xff]   ;;  %v861_v16 = vld [vmem:[%s1146_s1 + $0x40] ss:$8 sps:$4 sm:$0xff]  }
  0x1a   : > { %575 = vmatpush1.bf16.msra.mxu0 %v873_v12  ;;  %v862_v17 = vld [vmem:[%s1146_s1 + $0x54] ss:$8 sps:$4 sm:$0xff]   ;;  %v883_v18 = vld [vmem:[%s1146_s1 + $0x124] ss:$8 sps:$4 sm:$0xff]   ;;  %v885_v19 = vld [vmem:[%s1146_s1 + $0x120] ss:$8 sps:$4 sm:$0xff]  }
  0x1b   : > { %534 = vmatpush1.bf16.msra.mxu1 %v852_v6  ;;  %576 = vmatprep.subr.bf16.mxu0 %v877_v14  ;;  %v864_v20 = vld [vmem:[%s1146_s1 + $0x50] ss:$8 sps:$4 sm:$0xff]   ;;  %v889_v21 = vld [vmem:[%s1146_s1 + $0x134] ss:$8 sps:$4 sm:$0xff]   ;;  %v865_v22 = vld [vmem:[%s1146_s1 + $0x64] ss:$8 sps:$4 sm:$0xff]  }
  0x1c   : > { %535 = vmatprep.subr.bf16.mxu1 %v853_v7  ;;  %v891_v23 = vld [vmem:[%s1146_s1 + $0x130] ss:$8 sps:$4 sm:$0xff]   ;;  %v867_v24 = vld [vmem:[%s1146_s1 + $0x60] ss:$8 sps:$4 sm:$0xff]   ;;  %v895_v25 = vld [vmem:[%s1146_s1 + $0x144] ss:$8 sps:$4 sm:$0xff]  }
  0x1d   : > { %v868_v26 = vld [vmem:[%s1146_s1 + $0x74] ss:$8 sps:$4 sm:$0xff]   ;;  %v897_v27 = vld [vmem:[%s1146_s1 + $0x140] ss:$8 sps:$4 sm:$0xff]   ;;  %v870_v28 = vld [vmem:[%s1146_s1 + $0x70] ss:$8 sps:$4 sm:$0xff]  }
  0x1e   : > { %577 = vmatpush1.bf16.msra.mxu0 %v879_v15  ;;  %v901_v29 = vld [vmem:[%s1146_s1 + $0x154] ss:$8 sps:$4 sm:$0xff]   ;;  %v874_v30 = vld [vmem:[%s1146_s1 + $0x84] ss:$8 sps:$4 sm:$0xff]   ;;  %v903_v31 = vld [vmem:[%s1146_s1 + $0x150] ss:$8 sps:$4 sm:$0xff]  }
  0x1f   : > { %536 = vmatpush1.bf16.msra.mxu1 %v855_v8  ;;  %578 = vmatprep.subr.bf16.mxu0 %v883_v18  ;;  %v876_v32 = vld [vmem:[%s1146_s1 + $0x80] ss:$8 sps:$4 sm:$0xff]   ;;  %v907_v33 = vld [vmem:[%s1146_s1 + $0x164] ss:$8 sps:$4 sm:$0xff]   ;;  %v880_v34 = vld [vmem:[%s1146_s1 + $0x94] ss:$8 sps:$4 sm:$0xff]  }
  0x20   : > { %537 = vmatprep.subr.bf16.mxu1 %v856_v9  ;;  %v829_v35 = vld [vmem:[%s967_s22] sm:$0xff]   ;;  %v882_v39 = vld [vmem:[%s1146_s1 + $0x90] ss:$8 sps:$4 sm:$0xff]   ;;  %vm216_vm2 = vcmask 1040384   ;;  %v913_v41 = vld [vmem:[%s1146_s1 + $0x174] ss:$8 sps:$4 sm:$0xff]  }
  0x21   : > { %v919_v36 = vld [vmem:[%s967_s22] sm:$0xff]  ;;  %v830_v37 = vunpack.c.l.bf16 %v829_v35  ;;  %v831_v38 = vunpack.c.h.bf16 %v829_v35  ;;  %v915_v49 = vld [vmem:[%s1146_s1 + $0x170] ss:$8 sps:$4 sm:$0xff]   ;;  %v892_v51 = vld [vmem:[%s1146_s1 + $0xb4] ss:$8 sps:$4 sm:$0xff]  }
  0x22   : > { %579 = vmatpush1.bf16.msra.mxu0 %v885_v19  ;;  %v909_v40 = vld [vmem:[%s1146_s1 + $0x160] ss:$8 sps:$4 sm:$0xff]   ;;  %563 = vmatprep.mubr.bf16.mxu1 %v919_v36  ;;  %v886_v46 = vld [vmem:[%s1146_s1 + $0xa4] ss:$8 sps:$4 sm:$0xff]   ;;  %v894_v52 = vld [vmem:[%s1146_s1 + $0xb0] ss:$8 sps:$4 sm:$0xff]  }
  0x23   : > { %538 = vmatpush1.bf16.msra.mxu1 %v858_v10  ;;  %580 = vmatprep.subr.bf16.mxu0 %v889_v21  ;;  %v227_v42 = vrot.slane %v830_v37, 1  ;;  %v228_v43 = vrot.slane %v831_v38, 1  ;;  %v217_v44 = vrot.slane %v830_v37, 7  ;;  %v218_v45 = vrot.slane %v831_v38, 7  ;;  %v888_v50 = vld [vmem:[%s1146_s1 + $0xa0] ss:$8 sps:$4 sm:$0xff]  }
  0x24   : > { %539 = vmatprep.subr.bf16.mxu1 %v859_v13  ;;  %v898_v53 = vld [vmem:[%s1146_s1 + $0xc4] ss:$8 sps:$4 sm:$0xff]   ;;  %v900_v56 = vld [vmem:[%s1146_s1 + $0xc0] ss:$8 sps:$4 sm:$0xff]   ;;  %v904_v57 = vld [vmem:[%s1146_s1 + $0xd4] ss:$8 sps:$4 sm:$0xff]  }
  0x25   : > { %v229_v47 = vsel %vm226_vm1, %v227_v42, %v228_v43  ;;  %233 = vst [vmem:[#allocation2 + $0x28] sm:$0x7f] %v228_v43  ;;  %v219_v48 = vsel %vm216_vm2, %v217_v44, %v218_v45  ;;  %222 = vst [vmem:[#allocation2] sm:$0xfe] %v217_v44  ;;  %v906_v58 = vld [vmem:[%s1146_s1 + $0xd0] ss:$8 sps:$4 sm:$0xff]  }
  0x26   : > { %581 = vmatpush1.bf16.msra.mxu0 %v891_v23  ;;  %v910_v59 = vld [vmem:[%s1146_s1 + $0xe4] ss:$8 sps:$4 sm:$0xff]   ;;  %v912_v60 = vld [vmem:[%s1146_s1 + $0xe0] ss:$8 sps:$4 sm:$0xff]   ;;  %v916_v61 = vld [vmem:[%s1146_s1 + $0xf4] ss:$8 sps:$4 sm:$0xff]  }
  0x27   : > { %540 = vmatpush1.bf16.msra.mxu1 %v861_v16  ;;  %582 = vmatprep.subr.bf16.mxu0 %v895_v25  ;;  %v918_v62 = vld [vmem:[%s1146_s1 + $0xf0] ss:$8 sps:$4 sm:$0xff]  }
  0x28   : > { %541 = vmatprep.subr.bf16.mxu1 %v862_v17 }
  0x2a   : > { %583 = vmatpush1.bf16.msra.mxu0 %v897_v27 }
  0x2b   : > { %542 = vmatpush1.bf16.msra.mxu1 %v864_v20  ;;  %584 = vmatprep.subr.bf16.mxu0 %v901_v29 }
  0x2c   : > { %543 = vmatprep.subr.bf16.mxu1 %v865_v22  ;;  %v239_v54 = vld [vmem:[#allocation2 + $0x28] sm:$0xff]  ;;  %v234_v63 = vld [vmem:[#allocation2] sm:$0xff] }
  0x2d   : > { %v242_v55 = vpack.c.bf16 %v239_v54, %v229_v47  ;;  %v240_v0 = vpack.c.bf16 %v219_v48, %v234_v63  ;;  %v621_v54 = vld [vmem:[%s1148_s3] sm:$0x3] }
  0x2e   : > { %585 = vmatpush1.bf16.msra.mxu0 %v903_v31 }
  0x2f   : > { %544 = vmatpush1.bf16.msra.mxu1 %v867_v24  ;;  %586 = vmatprep.subr.bf16.mxu0 %v907_v33 }
  0x30   : > { %545 = vmatprep.subr.bf16.mxu1 %v868_v26  ;;  %v930_v26 = vmov 1966171168  }
  0x31   : > { %v640_v27 = vunpack.c.l.s4 %v930_v26 }
  0x32   : > { %587 = vmatpush1.bf16.msra.mxu0 %v909_v40 }
  0x33   : > { %546 = vmatpush1.bf16.msra.mxu1 %v870_v28  ;;  %588 = vmatprep.subr.bf16.mxu0 %v913_v41  ;;  %v642_v28 = vlaneseq  ;;  %v641_v37 = vunpack.c.0.s8 %v640_v27 }
  0x34   : > { %547 = vmatprep.subr.bf16.mxu1 %v874_v30 }
  0x35   : > { %v643_v38 = vshrl.u32 %v642_v28, 7  ;;  %vm657_vm3 = vcmp.lt.s32.totalorder %v642_v28, 256 }
  0x36   : > { %589 = vmatpush1.bf16.msra.mxu0 %v915_v49 }
  0x37   : > { %548 = vmatpush1.bf16.msra.mxu1 %v876_v32  ;;  %v644_v47 = vsub.s32 %v641_v37, %v643_v38 }
  0x38   : > { %549 = vmatprep.subr.bf16.mxu1 %v880_v34 }
  0x39   : > { %607 = vmatmul.mubr.bf16.vlgmr.msra.gmra.mrb[0].mxu0 %v242_v55 }
  0x3b   : > { %550 = vmatpush1.bf16.msra.mxu1 %v882_v39 }
  0x3c   : > { %551 = vmatprep.subr.bf16.mxu1 %v886_v46 }
  0x3f   : > { %552 = vmatpush1.bf16.msra.mxu1 %v888_v50 }
  0x40   : > { %553 = vmatprep.subr.bf16.mxu1 %v892_v51 }
  0x43   : > { %554 = vmatpush1.bf16.msra.mxu1 %v894_v52 }
  0x44   : > { %555 = vmatprep.subr.bf16.mxu1 %v898_v53 }
  0x47   : > { %556 = vmatpush1.bf16.msra.mxu1 %v900_v56 }
  0x48   : > { %557 = vmatprep.subr.bf16.mxu1 %v904_v57  ;;  %v660_v57 = vld [vmem:[%s1149_s4] sm:$0x3] }
  0x4b   : > { %558 = vmatpush1.bf16.msra.mxu1 %v906_v58 }
  0x4c   : > { %559 = vmatprep.subr.bf16.mxu1 %v910_v59 }
  0x4f   : > { %560 = vmatpush1.bf16.msra.mxu1 %v912_v60 }
  0x50   : > { %561 = vmatprep.subr.bf16.mxu1 %v916_v61 }
  0x53   : > { %562 = vmatpush1.bf16.msra.mxu1 %v918_v62 }
  0x56   : > { %564 = vmatmul.mubr.bf16.vlgmr.msra.gmra.mrb[0].mxu1 %v240_v0 }
 0x10c   : > { %v608_v1 = vpop.f32.mrb[0].mxu0 }
 0x10d   : > { %v610_v2 = vpop.f32.mrb[1].mxu0 }
 0x10e   : > { %v612_v3 = vpop.f32.mrb[2].mxu0 }
 0x10f   : > { %v614_v4 = vpop.f32.mrb[3].mxu0 }
 0x129   : > { %v565_v5 = vpop.f32.mrb[0].mxu1 }
 0x12a   : > { %v609_v6 = vadd.f32 %v608_v1, %v565_v5  ;;  %v567_v7 = vpop.f32.mrb[1].mxu1 }
 0x12b   : > { %v611_v8 = vadd.f32 %v610_v2, %v567_v7  ;;  %v569_v9 = vpop.f32.mrb[2].mxu1 }
 0x12c   : > { %617 = vst [vmem:[%s972_s25] sm:$0xff] %v609_v6  ;;  %v613_v10 = vadd.f32 %v612_v3, %v569_v9  ;;  %v571_v11 = vpop.f32.mrb[3].mxu1  ;;  %v661_v13 = vmul.f32 %v609_v6, %v609_v6 }
 0x12d   : > { %618 = vst [vmem:[%s972_s25 + $0x8] sm:$0xff] %v611_v8  ;;  %v615_v12 = vadd.f32 %v614_v4, %v571_v11  ;;  %v662_v16 = vmul.f32 %v611_v8, %v611_v8 }
 0x12e   : > { %619 = vst [vmem:[%s972_s25 + $0x10] sm:$0xff] %v613_v10  ;;  %v622_v14 = vadd.f32 %v613_v10, %v609_v6  ;;  %v663_v15 = vmul.f32 %v613_v10, %v613_v10 }
 0x12f   : > { %620 = vst [vmem:[%s972_s25 + $0x18] sm:$0xff] %v615_v12  ;;  %v629_v17 = vadd.f32 %v615_v12, %v611_v8  ;;  %v664_v18 = vmul.f32 %v615_v12, %v615_v12 }
 0x130   : > { %v623_v19 = vrot.slane %v622_v14, 4  ;;  %v665_v20 = vadd.f32 %v663_v15, %v661_v13 }
 0x131   : > { %v630_v21 = vrot.slane %v629_v17, 4  ;;  %v672_v22 = vadd.f32 %v664_v18, %v662_v16 }
 0x132   : > { %v624_v23 = vadd.f32 %v623_v19, %v622_v14  ;;  %v666_v24 = vrot.slane %v665_v20, 4 }
 0x133   : > { %v631_v25 = vadd.f32 %v630_v21, %v629_v17  ;;  %v673_v29 = vrot.slane %v672_v22, 4 }
 0x134   : > { %v625_v30 = vrot.slane %v624_v23, 2  ;;  %v667_v31 = vadd.f32 %v666_v24, %v665_v20 }
 0x135   : > { %v632_v32 = vrot.slane %v631_v25, 2  ;;  %v674_v33 = vadd.f32 %v673_v29, %v672_v22 }
 0x136   : > { %v626_v34 = vadd.f32 %v625_v30, %v624_v23  ;;  %v668_v35 = vrot.slane %v667_v31, 2 }
 0x137   : > { %v633_v36 = vadd.f32 %v632_v32, %v631_v25  ;;  %v675_v39 = vrot.slane %v674_v33, 2 }
 0x138   : > { %v627_v40 = vrot.slane %v626_v34, 1  ;;  %v669_v41 = vadd.f32 %v668_v35, %v667_v31 }
 0x139   : > { %v634_v42 = vrot.slane %v633_v36, 1  ;;  %v676_v43 = vadd.f32 %v675_v39, %v674_v33 }
 0x13a   : > { %v628_v44 = vadd.f32 %v627_v40, %v626_v34  ;;  %v670_v45 = vrot.slane %v669_v41, 1 }
 0x13b   : > { %v635_v46 = vadd.f32 %v634_v42, %v633_v36  ;;  %v677_v48 = vrot.slane %v676_v43, 1 }
 0x13c   : > { %v671_v49 = vadd.f32 %v670_v45, %v669_v41 }
 0x13d   : > { %v638_v50 = vcombine.low %v628_v44, %v635_v46  ;;  %v678_v51 = vadd.f32 %v677_v48, %v676_v43 }
 0x13f   : > { %v645_v52 = vrot.slane %v638_v50, %v644_v47  ;;  %v681_v53 = vcombine.low %v671_v49, %v678_v51 }
 0x141   : > { %v652_v55 = vrot.slane %v645_v52, %v644_v47  ;;  %v688_v56 = vrot.slane %v681_v53, %v644_v47 }
 0x143   : > { %v654_v58 = vadd.f32 %v652_v55, %v621_v54  ;;  %v695_v59 = vrot.slane %v688_v56, %v644_v47 }
 0x145   : > { %659 = vst.msk [vmem:[%s1148_s3] sm:$0x3] %vm657_vm3, %v654_v58  ;;  %v697_v60 = vadd.f32 %v695_v59, %v660_v57 }
 0x147   : > { %698 = vst.msk [vmem:[%s1149_s4] sm:$0x3] %vm657_vm3, %v697_v60 }
 0x148 PF: > { %s15_s15 = sadd.s32 1, %s926_s15  }
 0x149   : > { %p12_p5 = scmp.ge.s32.totalorder %s15_s15, 4  }
 0x14b   :  { %14 = sbr.rel (!%p12_p5) target bundleno = 1 (0x1), region = 78 }

// kernel: resblock_forward.5
= control target key start
LH: loop header
LB: loop body
LE: loop exit
PB: predicated region body
PF: predicated region fallthrough
CT: control target
= control target key end

     0   :  { %s614_s24 = smov 0   ;;  %s616_s25 = smov 0   ;;  %s702_s0 = inlined_call_operand.vmem [shape: f32[2,16,128], index: 0, kind: input, shape index: {}]   ;;  %s703_s1 = inlined_call_operand.vmem [shape: f32[2,16,256], index: 1, kind: input, shape index: {}]   ;;  %s704_s2 = inlined_call_operand.vmem [shape: f32[1,128], index: 2, kind: input, shape index: {}]   ;;  %s705_s3 = inlined_call_operand.vmem [shape: f32[1,128], index: 3, kind: input, shape index: {}]   ;;  %s706_s4 = inlined_call_operand.vmem [shape: f32[1,256], index: 4, kind: input, shape index: {}]   ;;  %s707_s5 = inlined_call_operand.vmem [shape: f32[1,256], index: 5, kind: input, shape index: {}]   ;;  %s708_s6 = inlined_call_operand.vmem [shape: f32[6,128], index: 6, kind: input, shape index: {}]   ;;  %s709_s7 = inlined_call_operand.vmem [shape: f32[2,16,128], index: 7, kind: output, shape index: {}]  }
   0x1   :  { %s618_s26 = smov 0  }
   0x2 LB: > { %s498_s27 = sadd.s32 4294967295, %s572_s26   ;;  %s631_s28 = sadd.s32 1, %s572_s26   ;;  %s572_s26 = sphi %s618_s26, %s712_s26   ;;  %s568_s25 = sphi %s616_s25, %s711_s25   ;;  %s564_s24 = sphi %s614_s24, %s710_s24  }
   0x3   : > { %s47_s29 = ssub.s32 %s572_s26, %s631_s28  ;;  %s50_s30 = sadd.s32 1, %s568_s25 }
   0x4   : > { %p48_p0 = scmp.eq.s32.totalorder %s47_s29, 0  ;;  %p57_p1 = scmp.ne.s32.totalorder %s568_s25, %s564_s24 }
   0x5   : > { %p58_p2 = scmp.eq.s32.totalorder %s572_s26, 0  ;;  %p503_p4 = scmp.ge.s32.totalorder %s572_s26, 2 }
   0x6   : > { %s640_s8 = scalar_select %p48_p0, %s568_s25, %s50_s30  }
   0x7   : > { %p59_p3 = por %p58_p2, %p57_p1  ;;  %231 = sbr.rel (%p503_p4) target bundleno = 21 (0x15), region = 36 }
   0xe   : > { %242 = sbr.rel (!%p59_p3) target bundleno = 21 (0x15), region = 44  ;;  %s244_s9 = sand.u32 (%p59_p3), 1, %s568_s25  }
   0xf   : > { %s519_s10 = sshll.u32 (%p59_p3), %s572_s26, 5  ;;  %s504_s11 = sshll.u32 (%p59_p3), %s244_s9, 4 }
  0x10   : > { %s432_s14 = scalar_lea.vmem (%p59_p3), %s703_s1, %s519_s10  ;;  %s246_s15 = scalar_lea.vmem (%p59_p3), [#allocation2], %s504_s11 }
  0x11   : > { %v507_v0 = vld [vmem:[%s432_s14 + $0x8] sm:$0xff] (%p59_p3)  ;;  %v508_v1 = vld [vmem:[%s432_s14 + $0x18] sm:$0xff] (%p59_p3) }
  0x12   : > { %281 = vst [vmem:[%s246_s15] sm:$0xff] (%p59_p3), %v507_v0  ;;  %283 = vst [vmem:[%s246_s15 + $0x8] sm:$0xff] (%p59_p3), %v508_v1 }
  0x15 PF: > { %p509_p5 = scmp.ge.s32.totalorder %s572_s26, 1  ;;  %p288_p6 = scmp.lt.s32.totalorder %s572_s26, 3 }
  0x17   : > { %p289_p7 = pnand %p509_p5, %p288_p6 }
  0x18   : > { %v345_v2 = vld [vmem:[%s704_s2] sm:$0x1] (!%p289_p7)  ;;  %v515_v6 = vld [vmem:[%s706_s4 + $0x1] sm:$0x1] (!%p289_p7)  ;;  %p333_p8 = scmp.lt.s32.totalorder (!%p289_p7), %s498_s27, 1  ;;  %v373_v16 = vlaneseq (!%p289_p7)  ;;  %s295_s29 = sand.u32 (!%p289_p7), 1, %s564_s24  }
  0x19   : > { %292 = sbr.rel (%p289_p7) target bundleno = 60 (0x3c), region = 82  ;;  %v347_v3 = vld [vmem:[%s705_s3] sm:$0x1] (!%p289_p7)  ;;  %v346_v4 = vmul.f32 (!%p289_p7), 0.03125, %v345_v2  ;;  %v359_v8 = vmul.f32 (!%p289_p7), 0.03125, %v515_v6  ;;  %s510_s11 = sshll.u32 (!%p289_p7), %s295_s29, 4 }
  0x1a   : > { %v348_v5 = vmul.f32 (!%p289_p7), 0.03125, %v347_v3  ;;  %v516_v9 = vld [vmem:[%s707_s5 + $0x1] sm:$0x1] (!%p289_p7)  ;;  %v374_v17 = vshrl.u32 (!%p289_p7), %v373_v16, 7  ;;  %v351_v18 = vld [vmem:[%s708_s6 + $0x2] sm:$0x1] (!%p289_p7) }
  0x1b   : > { %v349_v7 = vmul.f32 (!%p289_p7), %v346_v4, %v346_v4  ;;  %v361_v10 = vmul.f32 (!%p289_p7), 0.03125, %v516_v9  ;;  %v362_v12 = vmul.f32 (!%p289_p7), %v359_v8, %v359_v8  ;;  %v364_v21 = vld [vmem:[%s708_s6 + $0x4] sm:$0x1] (!%p289_p7)  ;;  %v355_v24 = vld [vmem:[%s708_s6 + $0x3] sm:$0x1] (!%p289_p7)  ;;  %s297_s19 = scalar_lea.vmem (!%p289_p7), [#allocation2], %s510_s11 }
  0x1c   : > { %v375_v19 = vsub.s32 (!%p289_p7), 0, %v374_v17  ;;  %v368_v30 = vld [vmem:[%s708_s6 + $0x5] sm:$0x1] (!%p289_p7)  ;;  %v386_v36 = vld [vmem:[%s297_s19 + $0x8] sm:$0xff] (!%p289_p7) }
  0x1d   : > { %v350_v11 = vsub.f32 (!%p289_p7), %v348_v5, %v349_v7  ;;  %v363_v14 = vsub.f32 (!%p289_p7), %v361_v10, %v362_v12  ;;  %v385_v35 = vld [vmem:[%s297_s19] sm:$0xff] (!%p289_p7) }
  0x1f   : > { %v352_v13 = vadd.f32 (!%p289_p7), 1e-05, %v350_v11  ;;  %v365_v15 = vadd.f32 (!%p289_p7), 1e-05, %v363_v14 }
  0x20   : > { %s714_s27 = smov (!%p333_p8, %s498_s27), 1 }
  0x21   : > { %546 = vrsqrt.f32 %v352_v13  ;;  %s520_s30 = sshll.u32 %s714_s27, 4 }
  0x22   : > { %548 = vrsqrt.f32 %v365_v15  ;;  %s337_s14 = scalar_lea.vmem %s702_s0, %s520_s30  ;;  %s344_s22 = scalar_lea.vmem %s709_s7, %s520_s30 }
  0x23   : > { %v371_v25 = vld [vmem:[%s337_s14] sm:$0xff]  ;;  %v372_v26 = vld [vmem:[%s337_s14 + $0x8] sm:$0xff] }
  0x2b   : > { %v547_v20 = vpop.eup %546 }
  0x2c   : > { %v354_v22 = vmul.f32 %v547_v20, %v351_v18  ;;  %v549_v23 = vpop.eup %548 }
  0x2d   : > { %v367_v28 = vmul.f32 %v549_v23, %v364_v21 }
  0x2e   : > { %v356_v27 = vmul.f32 %v354_v22, %v346_v4  ;;  %v376_v29 = vrot.slane %v354_v22, %v375_v19 }
  0x2f   : > { %v369_v32 = vmul.f32 %v367_v28, %v359_v8  ;;  %v390_v37 = vrot.slane %v367_v28, %v375_v19 }
  0x30   : > { %v357_v31 = vsub.f32 %v355_v24, %v356_v27  ;;  %v377_v33 = vmul.f32 %v376_v29, %v371_v25  ;;  %v378_v34 = vmul.f32 %v376_v29, %v372_v26 }
  0x31   : > { %v370_v38 = vsub.f32 %v368_v30, %v369_v32  ;;  %v391_v40 = vmul.f32 %v390_v37, %v385_v35  ;;  %v392_v41 = vmul.f32 %v390_v37, %v386_v36 }
  0x32   : > { %v382_v39 = vrot.slane %v357_v31, %v375_v19 }
  0x33   : > { %v396_v43 = vrot.slane %v370_v38, %v375_v19 }
  0x34   : > { %v383_v42 = vadd.f32 %v382_v39, %v377_v33  ;;  %v384_v44 = vadd.f32 %v382_v39, %v378_v34 }
  0x35   : > { %v397_v45 = vadd.f32 %v396_v43, %v391_v40  ;;  %v398_v46 = vadd.f32 %v396_v43, %v392_v41 }
  0x37   : > { %v399_v47 = vadd.f32 %v397_v45, %v383_v42  ;;  %v400_v48 = vadd.f32 %v398_v46, %v384_v44 }
  0x39   : > { %v401_v49 = vmax.f32 %v399_v47, 0.0  ;;  %v402_v50 = vmax.f32 %v400_v48, 0.0 }
  0x3b   : > { %403 = vst [vmem:[%s344_s22] sm:$0xff] %v401_v49  ;;  %404 = vst [vmem:[%s344_s22 + $0x8] sm:$0xff] %v402_v50 }
  0x3c PF: > { %p14_p9 = scmp.ge.s32.totalorder %s631_s28, 4   ;;  %s710_s24 = smov %s568_s25 }
  0x3d   : > { %s711_s25 = smov %s640_s8  ;;  %s712_s26 = smov %s631_s28 }
  0x3e   :  { %16 = sbr.rel (!%p14_p9) target bundleno = 2 (0x2), region = 130 }

// kernel: resblock_forward.4
= control target key start
LH: loop header
LB: loop body
LE: loop exit
PB: predicated region body
PF: predicated region fallthrough
CT: control target
= control target key end

     0   :  { %s966_s24 = smov 0   ;;  %s968_s25 = smov 0   ;;  %s1124_s0 = inlined_call_operand.vmem [shape: f32[2,16,256], index: 0, kind: input, shape index: {}]   ;;  %s1125_s1 = inlined_call_operand.vmem [shape: f32[1,256], index: 1, kind: input, shape index: {}]   ;;  %s1126_s2 = inlined_call_operand.vmem [shape: f32[1,256], index: 2, kind: input, shape index: {}]   ;;  %s1127_s3 = inlined_call_operand.vmem [shape: f32[6,128], index: 3, kind: input, shape index: {}]   ;;  %s1128_s4 = inlined_call_operand.vmem [shape: bf16[384,128], index: 4, kind: input, shape index: {}]   ;;  %s1129_s5 = inlined_call_operand.vmem [shape: f32[2,16,128], index: 5, kind: output, shape index: {0}]   ;;  %s1130_s6 = inlined_call_operand.vmem [shape: f32[1,128], index: 6, kind: output, shape index: {1}]   ;;  %s1131_s7 = inlined_call_operand.vmem [shape: f32[1,128], index: 7, kind: output, shape index: {2}]  }
   0x1   :  { %s970_s26 = smov 0  }
   0x2 LB: > { %s979_s27 = sadd.s32 4294967295, %s921_s26   ;;  %s981_s28 = sadd.s32 1, %s921_s26   ;;  %s921_s26 = sphi %s970_s26, %s1134_s26   ;;  %s917_s25 = sphi %s968_s25, %s1133_s25   ;;  %s913_s24 = sphi %s966_s24, %s1132_s24  }
   0x3   : > { %s22_s29 = ssub.s32 %s921_s26, %s981_s28  ;;  %s25_s30 = sadd.s32 1, %s917_s25 }
   0x4   : > { %p23_p0 = scmp.eq.s32.totalorder %s22_s29, 0  ;;  %p32_p1 = scmp.ne.s32.totalorder %s917_s25, %s913_s24 }
   0x5   : > { %p33_p2 = scmp.eq.s32.totalorder %s921_s26, 0  ;;  %p758_p4 = scmp.ge.s32.totalorder %s921_s26, 2 }
   0x6   : > { %s988_s8 = scalar_select %p23_p0, %s917_s25, %s25_s30  }
   0x7   : > { %p34_p3 = por %p33_p2, %p32_p1  ;;  %222 = sbr.rel (%p758_p4) target bundleno = 21 (0x15), region = 32 }
   0xe   : > { %225 = sbr.rel (!%p34_p3) target bundleno = 21 (0x15), region = 36  ;;  %s227_s9 = sand.u32 (%p34_p3), 1, %s917_s25  }
   0xf   : > { %s793_s10 = sshll.u32 (%p34_p3), %s921_s26, 5  ;;  %s759_s11 = sshll.u32 (%p34_p3), %s227_s9, 4 }
  0x10   : > { %s232_s14 = scalar_lea.vmem (%p34_p3), %s1124_s0, %s793_s10  ;;  %s229_s15 = scalar_lea.vmem (%p34_p3), [#allocation3], %s759_s11 }
  0x11   : > { %v262_v0 = vld [vmem:[%s232_s14] sm:$0xff] (%p34_p3)  ;;  %v264_v1 = vld [vmem:[%s232_s14 + $0x10] sm:$0xff] (%p34_p3) }
  0x12   : > { %263 = vst [vmem:[%s229_s15] sm:$0xff] (%p34_p3), %v262_v0  ;;  %265 = vst [vmem:[%s229_s15 + $0x8] sm:$0xff] (%p34_p3), %v264_v1 }
  0x15 PF: > { %p762_p5 = scmp.ge.s32.totalorder %s921_s26, 1  ;;  %p270_p6 = scmp.lt.s32.totalorder %s921_s26, 3 }
  0x17   : > { %p271_p7 = pnand %p762_p5, %p270_p6 }
  0x18   : > { %s277_s16 = sand.u32 (!%p271_p7), 1, %s913_s24   ;;  %p308_p8 = scmp.lt.s32.totalorder (!%p271_p7), %s979_s27, 1 }
  0x19   : > { %274 = sbr.rel (%p271_p7) target bundleno = 328 (0x148), region = 74  ;;  %s996_s17 = sshll.u32 (!%p271_p7), %s277_s16, 4 }
  0x1a   : > { %s279_s23 = scalar_lea.vmem (!%p271_p7), [#allocation3], %s996_s17  ;;  %p766_p9 = scmp.ne.s32.totalorder (!%p271_p7), %s979_s27, 0 }
  0x20   : > { %s309_s18 = scalar_select %p308_p8, %s979_s27, 1 }
  0x21   : > { %317 = sbr.rel (%p766_p9) target bundleno = 40 (0x28), region = 82  ;;  %v923_v2 = vmov (!%p766_p9), 0.0  }
  0x22   : > { %s794_s19 = sshll.u32 %s309_s18, 4  ;;  %318 = vst [vmem:[%s1130_s6] sm:$0x1] (!%p766_p9), %v923_v2  ;;  %319 = vst [vmem:[%s1131_s7] sm:$0x1] (!%p766_p9), %v923_v2 }
  0x23   : > { %s1002_s22 = scalar_lea.vmem %s1129_s5, %s794_s19  ;;  %320 = vst [vmem:[#allocation2] sm:$0xff] (!%p766_p9), %v923_v2  ;;  %325 = vst [vmem:[#allocation2 + $0x28] sm:$0xff] (!%p766_p9), %v923_v2 }
  0x28 PF: > { %v873_v3 = vld [vmem:[%s1128_s4 + $0x40] sm:$0xff]   ;;  %v924_v4 = vmov 0.0   ;;  %vm925_vm0 = vmmov 0   ;;  %v876_v7 = vld [vmem:[%s1128_s4 + $0x48] sm:$0xff]   ;;  %v879_v10 = vld [vmem:[%s1128_s4 + $0x50] sm:$0xff]   ;;  %v341_v35 = vlaneseq  ;;  %vm357_vm1 = vcmask 1040384  }
  0x29   : > { %826 = vmatprep.subr.bf16.mxu1 %v924_v4  ;;  %v874_v5 = vld [vmem:[%s1128_s4] sm:$0xff]   ;;  %795 = vmatprep.subr.bf16.mxu0 %v873_v3  ;;  %v877_v8 = vld [vmem:[%s1128_s4 + $0x8] sm:$0xff]   ;;  %v880_v11 = vld [vmem:[%s1128_s4 + $0x10] sm:$0xff]   ;;  %vm367_vm2 = vcmask 1046528  }
  0x2a   : > { %v875_v6 = vld [vmem:[%s1128_s4 + $0x80] sm:$0xff]   ;;  %842 = vmatprep.mubr.msk.bf16.mxu1 %vm925_vm0, %v924_v4  ;;  %796 = vmatpush3.bf16.msra.mxu0 %v874_v5  ;;  %v878_v9 = vld [vmem:[%s1128_s4 + $0x88] sm:$0xff]   ;;  %v881_v12 = vld [vmem:[%s1128_s4 + $0x90] sm:$0xff]   ;;  %v342_v36 = vshrl.u32 %v341_v35, 7 }
  0x2b   : > { %827 = vmatpush3.bf16.msra.mxu1 %v875_v6  ;;  %797 = vmatprep.subr.bf16.mxu0 %v876_v7  ;;  %v882_v13 = vld [vmem:[%s1128_s4 + $0x58] sm:$0xff]   ;;  %v885_v16 = vld [vmem:[%s1128_s4 + $0x60] sm:$0xff]   ;;  %v888_v19 = vld [vmem:[%s1128_s4 + $0x68] sm:$0xff]  }
  0x2c   : > { %828 = vmatprep.subr.bf16.mxu1 %v924_v4  ;;  %v883_v14 = vld [vmem:[%s1128_s4 + $0x18] sm:$0xff]   ;;  %v886_v17 = vld [vmem:[%s1128_s4 + $0x20] sm:$0xff]   ;;  %v889_v20 = vld [vmem:[%s1128_s4 + $0x28] sm:$0xff]   ;;  %v343_v38 = vsub.s32 0, %v342_v36 }
  0x2d   : > { %v884_v15 = vld [vmem:[%s1128_s4 + $0x98] sm:$0xff]   ;;  %v887_v18 = vld [vmem:[%s1128_s4 + $0xa0] sm:$0xff]   ;;  %v890_v21 = vld [vmem:[%s1128_s4 + $0xa8] sm:$0xff]  }
  0x2e   : > { %798 = vmatpush3.bf16.msra.mxu0 %v877_v8  ;;  %v891_v22 = vld [vmem:[%s1128_s4 + $0x70] sm:$0xff]   ;;  %v894_v25 = vld [vmem:[%s1128_s4 + $0x78] sm:$0xff]   ;;  %v326_v26 = vld [vmem:[%s1125_s1] sm:$0x1] }
  0x2f   : > { %829 = vmatpush3.bf16.msra.mxu1 %v878_v9  ;;  %799 = vmatprep.subr.bf16.mxu0 %v879_v10  ;;  %v892_v23 = vld [vmem:[%s1128_s4 + $0x30] sm:$0xff]   ;;  %v328_v27 = vld [vmem:[%s1126_s2] sm:$0x1]  ;;  %v327_v28 = vmul.f32 0.03125, %v326_v26  ;;  %v895_v30 = vld [vmem:[%s1128_s4 + $0x38] sm:$0xff]  }
  0x30   : > { %830 = vmatprep.subr.bf16.mxu1 %v924_v4  ;;  %v893_v24 = vld [vmem:[%s1128_s4 + $0xb0] sm:$0xff]   ;;  %v329_v29 = vmul.f32 0.03125, %v328_v27  ;;  %v896_v32 = vld [vmem:[%s1128_s4 + $0xb8] sm:$0xff]   ;;  %v332_v37 = vld [vmem:[%s1127_s3] sm:$0x1] }
  0x31   : > { %v330_v31 = vmul.f32 %v327_v28, %v327_v28  ;;  %v336_v41 = vld [vmem:[%s1127_s3 + $0x1] sm:$0x1]  ;;  %v340_v43 = vld [vmem:[%s279_s23 + $0x8] sm:$0xff]  ;;  %v660_v26 = vld [vmem:[%s1130_s6] sm:$0x1] }
  0x32   : > { %800 = vmatpush3.bf16.msra.mxu0 %v880_v11  ;;  %v339_v42 = vld [vmem:[%s279_s23] sm:$0xff] }
  0x33   : > { %831 = vmatpush3.bf16.msra.mxu1 %v881_v12  ;;  %801 = vmatprep.subr.bf16.mxu0 %v882_v13  ;;  %v331_v33 = vsub.f32 %v329_v29, %v330_v31  ;;  %v670_v29 = vld [vmem:[%s1131_s7] sm:$0x1] }
  0x34   : > { %832 = vmatprep.subr.bf16.mxu1 %v924_v4 }
  0x35   : > { %v333_v34 = vadd.f32 1e-05, %v331_v33 }
  0x36   : > { %802 = vmatpush3.bf16.msra.mxu0 %v883_v14 }
  0x37   : > { %833 = vmatpush3.bf16.msra.mxu1 %v884_v15  ;;  %803 = vmatprep.subr.bf16.mxu0 %v885_v16  ;;  %897 = vrsqrt.f32 %v333_v34 }
  0x38   : > { %834 = vmatprep.subr.bf16.mxu1 %v924_v4 }
  0x3a   : > { %804 = vmatpush3.bf16.msra.mxu0 %v886_v17 }
  0x3b   : > { %835 = vmatpush3.bf16.msra.mxu1 %v887_v18  ;;  %805 = vmatprep.subr.bf16.mxu0 %v888_v19 }
  0x3c   : > { %836 = vmatprep.subr.bf16.mxu1 %v924_v4 }
  0x3e   : > { %806 = vmatpush3.bf16.msra.mxu0 %v889_v20 }
  0x3f   : > { %837 = vmatpush3.bf16.msra.mxu1 %v890_v21  ;;  %807 = vmatprep.subr.bf16.mxu0 %v891_v22 }
  0x40   : > { %838 = vmatprep.subr.bf16.mxu1 %v924_v4 }
  0x41   : > { %v898_v39 = vpop.eup %897 }
  0x42   : > { %808 = vmatpush3.bf16.msra.mxu0 %v892_v23  ;;  %v335_v40 = vmul.f32 %v898_v39, %v332_v37 }
  0x43   : > { %839 = vmatpush3.bf16.msra.mxu1 %v893_v24  ;;  %809 = vmatprep.subr.bf16.mxu0 %v894_v25 }
  0x44   : > { %840 = vmatprep.subr.bf16.mxu1 %v924_v4  ;;  %v337_v44 = vmul.f32 %v335_v40, %v327_v28  ;;  %v344_v45 = vrot.slane %v335_v40, %v343_v38 }
  0x46   : > { %810 = vmatpush3.bf16.msra.mxu0 %v895_v30  ;;  %v338_v46 = vsub.f32 %v336_v41, %v337_v44  ;;  %v345_v47 = vmul.f32 %v344_v45, %v339_v42  ;;  %v346_v48 = vmul.f32 %v344_v45, %v340_v43 }
  0x47   : > { %841 = vmatpush3.bf16.msra.mxu1 %v896_v32 }
  0x48   : > { %v350_v49 = vrot.slane %v338_v46, %v343_v38 }
  0x4a   : > { %v351_v50 = vadd.f32 %v350_v49, %v345_v47  ;;  %v352_v51 = vadd.f32 %v350_v49, %v346_v48 }
  0x4c   : > { %v353_v52 = vmax.f32 %v351_v50, 0.0  ;;  %v354_v53 = vmax.f32 %v352_v51, 0.0 }
  0x4e   : > { %v382_v54 = vpack.c.bf16 %v354_v53, %v353_v52  ;;  %v358_v55 = vrot.slane %v353_v52, 7  ;;  %v359_v56 = vrot.slane %v354_v53, 7  ;;  %v368_v57 = vrot.slane %v353_v52, 1 }
  0x4f   : > { %v369_v58 = vrot.slane %v354_v53, 1 }
  0x50   : > { %608 = vmatprep.mubr.bf16.mxu0 %v382_v54  ;;  %v360_v59 = vsel %vm357_vm1, %v358_v55, %v359_v56  ;;  %363 = vst [vmem:[#allocation2] sm:$0xfe] %v358_v55 }
  0x51   : > { %v370_v60 = vsel %vm367_vm2, %v368_v57, %v369_v58  ;;  %374 = vst [vmem:[#allocation2 + $0x28] sm:$0x7f] %v369_v58 }
  0x57   : > { %v375_v61 = vld [vmem:[#allocation2] sm:$0xff] }
  0x58   : > { %v381_v62 = vpack.c.bf16 %v360_v59, %v375_v61  ;;  %v380_v63 = vld [vmem:[#allocation2 + $0x28] sm:$0xff] }
  0x59   : > { %v383_v0 = vpack.c.bf16 %v380_v63, %v370_v60 }
  0x5a   : > { %609 = vmatmul.mubr.bf16.vlgmr.msra.gmra.mrb[0].mxu0 %v381_v62 }
  0x5b   : > { %843 = vmatmul.mubr.bf16.vlgmr.msra.gmra.mrb[0].mxu1 %v383_v0 }
 0x12d   : > { %v811_v1 = vpop.f32.mrb[0].mxu0 }
 0x12e   : > { %v651_v2 = vpop.f32.mrb[0].mxu1  ;;  %v812_v3 = vpop.f32.mrb[1].mxu0 }
 0x12f   : > { %v813_v4 = vadd.f32 %v812_v3, %v811_v1  ;;  %v844_v5 = vpop.f32.mrb[1].mxu1  ;;  %v814_v6 = vpop.f32.mrb[2].mxu0 }
 0x130   : > { %v654_v7 = vpop.f32.mrb[2].mxu1  ;;  %v815_v8 = vpop.f32.mrb[3].mxu0 }
 0x131   : > { %v652_v9 = vadd.f32 %v813_v4, %v651_v2  ;;  %v816_v10 = vadd.f32 %v815_v8, %v814_v6  ;;  %v845_v11 = vpop.f32.mrb[3].mxu1 }
 0x133   : > { %658 = vst [vmem:[%s1002_s22] sm:$0xff] %v652_v9  ;;  %v655_v12 = vadd.f32 %v816_v10, %v654_v7  ;;  %v671_v13 = vmul.f32 %v652_v9, %v652_v9 }
 0x135   : > { %659 = vst [vmem:[%s1002_s22 + $0x8] sm:$0xff] %v655_v12  ;;  %v661_v14 = vadd.f32 %v655_v12, %v652_v9  ;;  %v672_v15 = vmul.f32 %v655_v12, %v655_v12 }
 0x137   : > { %v662_v16 = vrot.slane %v661_v14, 4  ;;  %v673_v17 = vadd.f32 %v672_v15, %v671_v13 }
 0x139   : > { %v663_v18 = vadd.f32 %v662_v16, %v661_v14  ;;  %v674_v19 = vrot.slane %v673_v17, 4 }
 0x13b   : > { %v664_v20 = vrot.slane %v663_v18, 2  ;;  %v675_v21 = vadd.f32 %v674_v19, %v673_v17 }
 0x13d   : > { %v665_v22 = vadd.f32 %v664_v20, %v663_v18  ;;  %v676_v23 = vrot.slane %v675_v21, 2 }
 0x13f   : > { %v666_v24 = vrot.slane %v665_v22, 1  ;;  %v677_v25 = vadd.f32 %v676_v23, %v675_v21 }
 0x141   : > { %v667_v27 = vadd.f32 %v666_v24, %v665_v22  ;;  %v678_v28 = vrot.slane %v677_v25, 1 }
 0x143   : > { %v668_v30 = vadd.f32 %v667_v27, %v660_v26  ;;  %v679_v31 = vadd.f32 %v678_v28, %v677_v25 }
 0x145   : > { %669 = vst [vmem:[%s1130_s6] sm:$0x1] %v668_v30  ;;  %v680_v32 = vadd.f32 %v679_v31, %v670_v29 }
 0x147   : > { %681 = vst [vmem:[%s1131_s7] sm:$0x1] %v680_v32 }
 0x148 PF: > { %p15_p10 = scmp.ge.s32.totalorder %s981_s28, 4   ;;  %s1132_s24 = smov %s917_s25 }
 0x149   : > { %s1133_s25 = smov %s988_s8  ;;  %s1134_s26 = smov %s981_s28 }
 0x14a   :  { %17 = sbr.rel (!%p15_p10) target bundleno = 2 (0x2), region = 133 }

</bundles_post_ra>
